<compile_context>
chip_gen: v6e
topology: v6e:2x2x1
jax: 0.10.0
libtpu: 0.0.40
codegen_flags: <defaults>
</compile_context>

<pallas_src>
import math
import functools

import jax
import jax.numpy as jnp
from jax.experimental import pallas as pl
from jax.experimental.pallas import tpu as pltpu


# ----------------------------------------------------------------------------
# Synthetic scaled-down BERT config (stand-in for bert-base-uncased)
# ----------------------------------------------------------------------------
HIDDEN = 128        # scaled-down stand-in for 768
N_LAYERS = 2
N_HEADS = 2
HEAD_DIM = HIDDEN // N_HEADS
INTERMEDIATE = 256
VOCAB = 64
TYPE_VOCAB = 2
MAX_POS = 16
HEADS_PAD = 128     # lane-dense padding for the fused NER+POS head

LN_EPS = 1e-12
_INV_SQRT2 = 1.0 / math.sqrt(2.0)
_ATTN_SCALE = 1.0 / math.sqrt(HEAD_DIM)


# ----------------------------------------------------------------------------
# In-kernel helpers (traced inside the Pallas body)
# ----------------------------------------------------------------------------
def _ln_f32(x, g, b):
    mean = jnp.mean(x, axis=-1, keepdims=True)
    var = jnp.mean(jnp.square(x - mean), axis=-1, keepdims=True)
    return (x - mean) * jax.lax.rsqrt(var + LN_EPS) * g + b


def _gelu_exact(x):
    # exact (erf-based) GELU, as used by BERT
    return 0.5 * x * (1.0 + jax.lax.erf(x * _INV_SQRT2))


# ----------------------------------------------------------------------------
# Fused kernel: embedding LN + all encoder layers + both task heads.
# grid = (token_tiles, N_LAYERS); activation stays resident in VMEM scratch
# across the (inner, "arbitrary") layer axis.
# ----------------------------------------------------------------------------
def _bert_stack_kernel(emb_ref, bias_ref,
                       emb_ln_g_ref, emb_ln_b_ref,
                       qkv_w_ref, qkv_b_ref, o_w_ref, o_b_ref,
                       ln1_g_ref, ln1_b_ref,
                       fi_w_ref, fi_b_ref, fo_w_ref, fo_b_ref,
                       ln2_g_ref, ln2_b_ref,
                       heads_w_ref, heads_b_ref,
                       logits_ref,
                       h_scratch):
    layer = pl.program_id(1)

    # Layer 0: load raw embeddings for this token tile and apply embedding LN.
    @pl.when(layer == 0)
    def _():
        e = emb_ref[...].astype(jnp.float32)
        h_scratch[...] = _ln_f32(e, emb_ln_g_ref[...], emb_ln_b_ref[...])

    h = h_scratch[...]                              # [T, H] f32 residual stream
    hb = h.astype(jnp.bfloat16)

    # Fused Q/K/V projection: [T, 3H] with f32 accumulation.
    qkv = jnp.dot(hb, qkv_w_ref[...],
                  preferred_element_type=jnp.float32) + qkv_b_ref[...]

    # Block-diagonal additive attention bias: [T, T] f32.
    bias = bias_ref[...]

    # Multi-head attention; heads are static lane slices of qkv, contexts are
    # concatenated back to [T, H] and projected with ONE K=HIDDEN matmul.
    ctx_heads = []
    for hh in range(N_HEADS):
        lo = hh * HEAD_DIM
        q_h = qkv[:, lo:lo + HEAD_DIM].astype(jnp.bfloat16)
        k_h = qkv[:, HIDDEN + lo:HIDDEN + lo + HEAD_DIM].astype(jnp.bfloat16)
        v_h = qkv[:, 2 * HIDDEN + lo:2 * HIDDEN + lo + HEAD_DIM].astype(jnp.bfloat16)

        # scores: contract last axes (q k^T without an explicit transpose)
        s = jax.lax.dot_general(
            q_h, k_h, (((1,), (1,)), ((), ())),
            preferred_element_type=jnp.float32) * _ATTN_SCALE     # [T, T]
        s = s + bias                                              # key + seq mask
        s = s - jnp.max(s, axis=-1, keepdims=True)
        p = jnp.exp(s)
        p = p * pl.reciprocal(jnp.sum(p, axis=-1, keepdims=True), approx=True)

        ctx_heads.append(jnp.dot(p.astype(jnp.bfloat16), v_h,
                                 preferred_element_type=jnp.float32))  # [T, Dh]
    ctx = jnp.concatenate(ctx_heads, axis=-1)                     # [T, H]

    attn_out = jnp.dot(ctx.astype(jnp.bfloat16), o_w_ref[...],
                       preferred_element_type=jnp.float32) + o_b_ref[...]
    h1 = _ln_f32(h + attn_out, ln1_g_ref[...], ln1_b_ref[...])

    inter = jnp.dot(h1.astype(jnp.bfloat16), fi_w_ref[...],
                    preferred_element_type=jnp.float32) + fi_b_ref[...]
    inter = _gelu_exact(inter)
    ffn_out = jnp.dot(inter.astype(jnp.bfloat16), fo_w_ref[...],
                      preferred_element_type=jnp.float32) + fo_b_ref[...]
    h2 = _ln_f32(h1 + ffn_out, ln2_g_ref[...], ln2_b_ref[...])
    h_scratch[...] = h2

    # Last layer: fused NER+POS heads (lane-dense padded matmul) as epilogue.
    # (dropout1/dropout2 are identity in inference mode.)
    @pl.when(layer == pl.num_programs(1) - 1)
    def _():
        logits = jnp.dot(h2.astype(jnp.bfloat16), heads_w_ref[...],
                         preferred_element_type=jnp.float32) + heads_b_ref[...]
        logits_ref[...] = logits.astype(logits_ref.dtype)


def bert_encoder_with_heads(prep, emb, attn_bias, num_tiles, tile_tokens):
    M, H = emb.shape
    L = prep["qkv_w"].shape[0]
    n_pad = prep["heads_w"].shape[1]

    bt_map2 = lambda bt, l: (bt, 0)
    bt_map3 = lambda bt, l: (bt, 0, 0)
    c_map2 = lambda bt, l: (0, 0)
    l_map3 = lambda bt, l: (l, 0, 0)

    in_specs = [
        pl.BlockSpec((tile_tokens, H), bt_map2),                   # emb (per tile)
        pl.BlockSpec((None, tile_tokens, tile_tokens), bt_map3),   # attn bias
        pl.BlockSpec((1, H), c_map2),                              # emb LN gamma
        pl.BlockSpec((1, H), c_map2),                              # emb LN beta
        pl.BlockSpec((None, H, 3 * H), l_map3),                    # qkv_w (bf16)
        pl.BlockSpec((None, 1, 3 * H), l_map3),                    # qkv_b
        pl.BlockSpec((None, H, H), l_map3),                        # o_w (bf16)
        pl.BlockSpec((None, 1, H), l_map3),                        # o_b
        pl.BlockSpec((None, 1, H), l_map3),                        # attn LN gamma
        pl.BlockSpec((None, 1, H), l_map3),                        # attn LN beta
        pl.BlockSpec((None, H, INTERMEDIATE), l_map3),             # ffn_i_w (bf16)
        pl.BlockSpec((None, 1, INTERMEDIATE), l_map3),             # ffn_i_b
        pl.BlockSpec((None, INTERMEDIATE, H), l_map3),             # ffn_o_w (bf16)
        pl.BlockSpec((None, 1, H), l_map3),                        # ffn_o_b
        pl.BlockSpec((None, 1, H), l_map3),                        # ffn LN gamma
        pl.BlockSpec((None, 1, H), l_map3),                        # ffn LN beta
        pl.BlockSpec((H, n_pad), c_map2),                          # fused heads W (bf16)
        pl.BlockSpec((1, n_pad), c_map2),                          # fused heads b
    ]
    return pl.pallas_call(
        _bert_stack_kernel,
        out_shape=jax.ShapeDtypeStruct((M, n_pad), jnp.float32),
        grid=(num_tiles, L),
        in_specs=in_specs,
        out_specs=pl.BlockSpec((tile_tokens, n_pad), bt_map2),
        scratch_shapes=[pltpu.VMEM((tile_tokens, HIDDEN), jnp.float32)],
        compiler_params=pltpu.CompilerParams(
            dimension_semantics=("parallel", "arbitrary")),
    )(emb, attn_bias,
      prep["emb_ln_g"], prep["emb_ln_b"],
      prep["qkv_w"], prep["qkv_b"], prep["o_w"], prep["o_b"],
      prep["ln1_g"], prep["ln1_b"],
      prep["fi_w"], prep["fi_b"], prep["fo_w"], prep["fo_b"],
      prep["ln2_g"], prep["ln2_b"],
      prep["heads_w"], prep["heads_b"])


# ----------------------------------------------------------------------------
# Deterministic parameter init (same structure as the PyTorch module)
# ----------------------------------------------------------------------------
def init_params(key, n_ner, n_pos):
    def nrm(k, shape, scale=0.02):
        return scale * jax.random.normal(k, shape, dtype=jnp.float32)

    keys = iter(jax.random.split(key, 256))
    p = {
        "word_emb": nrm(next(keys), (VOCAB, HIDDEN)),
        "pos_emb": nrm(next(keys), (MAX_POS, HIDDEN)),
        "type_emb": nrm(next(keys), (TYPE_VOCAB, HIDDEN)),
        "emb_ln_g": jnp.ones((HIDDEN,), jnp.float32),
        "emb_ln_b": jnp.zeros((HIDDEN,), jnp.float32),
        "layers": [],
        "head1_w": nrm(next(keys), (HIDDEN, n_ner)),
        "head1_b": jnp.zeros((n_ner,), jnp.float32),
        "head2_w": nrm(next(keys), (HIDDEN, n_pos)),
        "head2_b": jnp.zeros((n_pos,), jnp.float32),
    }
    for _ in range(N_LAYERS):
        p["layers"].append({
            "q_w": nrm(next(keys), (HIDDEN, HIDDEN)), "q_b": jnp.zeros((HIDDEN,), jnp.float32),
            "k_w": nrm(next(keys), (HIDDEN, HIDDEN)), "k_b": jnp.zeros((HIDDEN,), jnp.float32),
            "v_w": nrm(next(keys), (HIDDEN, HIDDEN)), "v_b": jnp.zeros((HIDDEN,), jnp.float32),
            "o_w": nrm(next(keys), (HIDDEN, HIDDEN)), "o_b": jnp.zeros((HIDDEN,), jnp.float32),
            "attn_ln_g": jnp.ones((HIDDEN,), jnp.float32),
            "attn_ln_b": jnp.zeros((HIDDEN,), jnp.float32),
            "ffn_i_w": nrm(next(keys), (HIDDEN, INTERMEDIATE)),
            "ffn_i_b": jnp.zeros((INTERMEDIATE,), jnp.float32),
            "ffn_o_w": nrm(next(keys), (INTERMEDIATE, HIDDEN)),
            "ffn_o_b": jnp.zeros((HIDDEN,), jnp.float32),
            "ffn_ln_g": jnp.ones((HIDDEN,), jnp.float32),
            "ffn_ln_b": jnp.zeros((HIDDEN,), jnp.float32),
        })
    return p


def prepare_inference_params(params, n_ner, n_pos):
    """One-time fusion/casting: QKV concat, per-layer weight stacking, bf16
    matmul weights, lane-dense padded fused heads."""
    wdt = jnp.bfloat16
    ls = params["layers"]
    stk = lambda name: jnp.stack([lp[name] for lp in ls], axis=0)

    prep = {
        "word_emb": params["word_emb"],
        "pos_emb": params["pos_emb"],
        "type_emb": params["type_emb"],
        "emb_ln_g": params["emb_ln_g"].reshape(1, HIDDEN),
        "emb_ln_b": params["emb_ln_b"].reshape(1, HIDDEN),
        "qkv_w": jnp.stack(
            [jnp.concatenate([lp["q_w"], lp["k_w"], lp["v_w"]], axis=1) for lp in ls],
            axis=0).astype(wdt),                                       # [L, H, 3H]
        "qkv_b": jnp.stack(
            [jnp.concatenate([lp["q_b"], lp["k_b"], lp["v_b"]]).reshape(1, 3 * HIDDEN)
             for lp in ls], axis=0),                                   # [L, 1, 3H]
        "o_w": stk("o_w").astype(wdt),                                 # [L, H, H]
        "o_b": stk("o_b").reshape(N_LAYERS, 1, HIDDEN),
        "ln1_g": stk("attn_ln_g").reshape(N_LAYERS, 1, HIDDEN),
        "ln1_b": stk("attn_ln_b").reshape(N_LAYERS, 1, HIDDEN),
        "fi_w": stk("ffn_i_w").astype(wdt),                            # [L, H, I]
        "fi_b": stk("ffn_i_b").reshape(N_LAYERS, 1, INTERMEDIATE),
        "fo_w": stk("ffn_o_w").astype(wdt),                            # [L, I, H]
        "fo_b": stk("ffn_o_b").reshape(N_LAYERS, 1, HIDDEN),
        "ln2_g": stk("ffn_ln_g").reshape(N_LAYERS, 1, HIDDEN),
        "ln2_b": stk("ffn_ln_b").reshape(N_LAYERS, 1, HIDDEN),
    }
    # lane-dense fused heads: [H, pad(n_ner + n_pos, 128)]
    n_total = n_ner + n_pos
    n_pad = max(HEADS_PAD, ((n_total + 127) // 128) * 128)
    hw = jnp.zeros((HIDDEN, n_pad), jnp.float32)
    hw = hw.at[:, :n_ner].set(params["head1_w"])
    hw = hw.at[:, n_ner:n_total].set(params["head2_w"])
    hb = jnp.zeros((1, n_pad), jnp.float32)
    hb = hb.at[0, :n_ner].set(params["head1_b"])
    hb = hb.at[0, n_ner:n_total].set(params["head2_b"])
    prep["heads_w"] = hw.astype(wdt)
    prep["heads_b"] = hb
    return prep


# ----------------------------------------------------------------------------
# Forward pass (BERT encoder + two heads); dropout is identity in eval mode
# ----------------------------------------------------------------------------
@functools.partial(jax.jit, static_argnames=("n_ner", "n_pos"))
def neurond_bert_multitask_forward(prep, input_ids, attention_mask, *, n_ner, n_pos):
    B, S = input_ids.shape
    M = B * S

    # Sequences per token tile: aim for >=256-token tiles (MXU-friendly M)
    # while dividing B evenly; at toy shapes this means all sequences at once.
    seqs_per_tile = min(B, max(1, 256 // S))
    while B % seqs_per_tile:
        seqs_per_tile -= 1
    tile_tokens = seqs_per_tile * S
    num_tiles = B // seqs_per_tile

    # Embeddings (gathers stay in plain JAX); token_type_ids assumed 0.
    positions = jnp.arange(S, dtype=jnp.int32)
    emb = (
        jnp.take(prep["word_emb"], input_ids, axis=0)
        + jnp.take(prep["pos_emb"], positions, axis=0)[None, :, :]
        + prep["type_emb"][0][None, None, :]
    ).reshape(M, HIDDEN)

    # Block-diagonal additive attention bias per token tile: 0 where the query
    # and key belong to the same sequence AND the key is unmasked, -1e9
    # otherwise.  exp(-1e9 - row_max) underflows to 0 in f32, so running one
    # attention over the whole tile is exactly per-sequence masked attention.
    tok_seq = jnp.arange(tile_tokens, dtype=jnp.int32) // S
    same_seq = tok_seq[:, None] == tok_seq[None, :]                  # [T, T]
    key_valid = attention_mask.astype(jnp.bool_).reshape(num_tiles, 1, tile_tokens)
    attn_bias = jnp.where(same_seq[None, :, :] & key_valid, 0.0, -1e9).astype(jnp.float32)

    logits = bert_encoder_with_heads(prep, emb, attn_bias, num_tiles, tile_tokens)

    # dropout1 / dropout2 are identity at inference (model.eval()).
    output_ner = logits[:, :n_ner].reshape(B, S, n_ner)
    output_pos = logits[:, n_ner:n_ner + n_pos].reshape(B, S, n_pos)
    return output_ner, output_pos


# ----------------------------------------------------------------------------
if __name__ == "__main__":
    B, S = 2, 8
    n_ner, n_pos = 5, 7

    key = jax.random.PRNGKey(0)
    k_params, k_ids = jax.random.split(key)

    params = init_params(k_params, n_ner, n_pos)
    prep = prepare_inference_params(params, n_ner, n_pos)

    input_ids = jax.random.randint(k_ids, (B, S), 0, VOCAB, dtype=jnp.int32)
    attention_mask = jnp.ones((B, S), dtype=jnp.int32).at[1, -2:].set(0)

    out_ner, out_pos = neurond_bert_multitask_forward(
        prep, input_ids, attention_mask, n_ner=n_ner, n_pos=n_pos)
    jax.block_until_ready((out_ner, out_pos))

    assert out_ner.shape == (B, S, n_ner)
    assert out_pos.shape == (B, S, n_pos)
    assert bool(jnp.all(jnp.isfinite(out_ner))) and bool(jnp.all(jnp.isfinite(out_pos)))
    print("KERNEL_OK")
</pallas_src>

<mosaic_0001>
module attributes {stable_mosaic.version = 11 : i64} {
  func.func @_bert_stack_kernel(%arg0: i32, %arg1: i32, %arg2: memref<16x128xf32, #tpu.memory_space<vmem>>, %arg3: memref<1x16x16xf32, #tpu.memory_space<vmem>>, %arg4: memref<1x128xf32, #tpu.memory_space<vmem>>, %arg5: memref<1x128xf32, #tpu.memory_space<vmem>>, %arg6: memref<1x128x384xbf16, #tpu.memory_space<vmem>>, %arg7: memref<1x1x384xf32, #tpu.memory_space<vmem>>, %arg8: memref<1x128x128xbf16, #tpu.memory_space<vmem>>, %arg9: memref<1x1x128xf32, #tpu.memory_space<vmem>>, %arg10: memref<1x1x128xf32, #tpu.memory_space<vmem>>, %arg11: memref<1x1x128xf32, #tpu.memory_space<vmem>>, %arg12: memref<1x128x256xbf16, #tpu.memory_space<vmem>>, %arg13: memref<1x1x256xf32, #tpu.memory_space<vmem>>, %arg14: memref<1x256x128xbf16, #tpu.memory_space<vmem>>, %arg15: memref<1x1x128xf32, #tpu.memory_space<vmem>>, %arg16: memref<1x1x128xf32, #tpu.memory_space<vmem>>, %arg17: memref<1x1x128xf32, #tpu.memory_space<vmem>>, %arg18: memref<128x128xbf16, #tpu.memory_space<vmem>>, %arg19: memref<1x128xf32, #tpu.memory_space<vmem>>, %arg20: memref<16x128xf32, #tpu.memory_space<vmem>>, %arg21: memref<16x128xf32, #tpu.memory_space<vmem>>) attributes {dimension_semantics = [#tpu.dimension_semantics<parallel>, #tpu.dimension_semantics<arbitrary>], iteration_bounds = array<i64: 1, 2>, scalar_prefetch = 0 : i64, scratch_operands = 1 : i64, tpu.core_type = #tpu.core_type<tc>, window_params = [{transform_indices = @transform_0, window_bounds = array<i64: 16, 128>}, {transform_indices = @transform_1, window_bounds = array<i64: 1, 16, 16>}, {pipeline_mode = #tpu.pipeline_mode<synchronous>, transform_indices = @transform_2, window_bounds = array<i64: 1, 128>}, {pipeline_mode = #tpu.pipeline_mode<synchronous>, transform_indices = @transform_3, window_bounds = array<i64: 1, 128>}, {transform_indices = @transform_4, window_bounds = array<i64: 1, 128, 384>}, {transform_indices = @transform_5, window_bounds = array<i64: 1, 1, 384>}, {transform_indices = @transform_6, window_bounds = array<i64: 1, 128, 128>}, {transform_indices = @transform_7, window_bounds = array<i64: 1, 1, 128>}, {transform_indices = @transform_8, window_bounds = array<i64: 1, 1, 128>}, {transform_indices = @transform_9, window_bounds = array<i64: 1, 1, 128>}, {transform_indices = @transform_10, window_bounds = array<i64: 1, 128, 256>}, {transform_indices = @transform_11, window_bounds = array<i64: 1, 1, 256>}, {transform_indices = @transform_12, window_bounds = array<i64: 1, 256, 128>}, {transform_indices = @transform_13, window_bounds = array<i64: 1, 1, 128>}, {transform_indices = @transform_14, window_bounds = array<i64: 1, 1, 128>}, {transform_indices = @transform_15, window_bounds = array<i64: 1, 1, 128>}, {pipeline_mode = #tpu.pipeline_mode<synchronous>, transform_indices = @transform_16, window_bounds = array<i64: 128, 128>}, {pipeline_mode = #tpu.pipeline_mode<synchronous>, transform_indices = @transform_17, window_bounds = array<i64: 1, 128>}, {transform_indices = @transform_18, window_bounds = array<i64: 16, 128>}]} {
    %c0_i32 = arith.constant 0 : i32
    %0 = arith.cmpi eq, %arg1, %c0_i32 : i32
    %1 = arith.extui %0 : i1 to i32
    %c0_i32_0 = arith.constant 0 : i32
    %2 = arith.cmpi ne, %1, %c0_i32_0 : i32
    scf.if %2 {
      %c0_70 = arith.constant 0 : index
      %c0_71 = arith.constant 0 : index
      %149 = vector.load %arg2[%c0_70, %c0_71] : memref<16x128xf32, #tpu.memory_space<vmem>>, vector<16x128xf32>
      %c0_72 = arith.constant 0 : index
      %c0_73 = arith.constant 0 : index
      %150 = vector.load %arg4[%c0_72, %c0_73] : memref<1x128xf32, #tpu.memory_space<vmem>>, vector<1x128xf32>
      %c0_74 = arith.constant 0 : index
      %c0_75 = arith.constant 0 : index
      %151 = vector.load %arg5[%c0_74, %c0_75] : memref<1x128xf32, #tpu.memory_space<vmem>>, vector<1x128xf32>
      %cst_76 = arith.constant dense<0.000000e+00> : vector<16xf32>
      %152 = vector.multi_reduction <add>, %149, %cst_76 [1] : vector<16x128xf32> to vector<16xf32>
      %153 = vector.shape_cast %152 : vector<16xf32> to vector<16x1xf32>
      %cst_77 = arith.constant 1.280000e+02 : f32
      %154 = vector.broadcast %cst_77 : f32 to vector<16x1xf32>
      %155 = arith.divf %153, %154 : vector<16x1xf32>
      %156 = vector.broadcast %155 : vector<16x1xf32> to vector<16x128xf32>
      %157 = arith.subf %149, %156 : vector<16x128xf32>
      %158 = arith.mulf %157, %157 : vector<16x128xf32>
      %cst_78 = arith.constant dense<0.000000e+00> : vector<16xf32>
      %159 = vector.multi_reduction <add>, %158, %cst_78 [1] : vector<16x128xf32> to vector<16xf32>
      %160 = vector.shape_cast %159 : vector<16xf32> to vector<16x1xf32>
      %cst_79 = arith.constant 1.280000e+02 : f32
      %161 = vector.broadcast %cst_79 : f32 to vector<16x1xf32>
      %162 = arith.divf %160, %161 : vector<16x1xf32>
      %163 = vector.broadcast %155 : vector<16x1xf32> to vector<16x128xf32>
      %164 = arith.subf %149, %163 : vector<16x128xf32>
      %cst_80 = arith.constant 9.99999996E-13 : f32
      %165 = vector.broadcast %cst_80 : f32 to vector<16x1xf32>
      %166 = arith.addf %162, %165 : vector<16x1xf32>
      %167 = math.rsqrt %166 : vector<16x1xf32>
      %168 = vector.broadcast %167 : vector<16x1xf32> to vector<16x128xf32>
      %169 = arith.mulf %164, %168 : vector<16x128xf32>
      %170 = vector.broadcast %150 : vector<1x128xf32> to vector<16x128xf32>
      %171 = arith.mulf %169, %170 : vector<16x128xf32>
      %172 = vector.broadcast %151 : vector<1x128xf32> to vector<16x128xf32>
      %173 = arith.addf %171, %172 : vector<16x128xf32>
      %c0_81 = arith.constant 0 : index
      %c0_82 = arith.constant 0 : index
      %174 = vector.load %arg21[%c0_81, %c0_82] : memref<16x128xf32, #tpu.memory_space<vmem>>, vector<16x128xf32>
      tpu.vector_store %arg21[%c0_81, %c0_82], %173 {strides = array<i32>} : memref<16x128xf32, #tpu.memory_space<vmem>>, vector<16x128xf32>,
    } else {
    }
    %c0 = arith.constant 0 : index
    %c0_1 = arith.constant 0 : index
    %3 = vector.load %arg21[%c0, %c0_1] : memref<16x128xf32, #tpu.memory_space<vmem>>, vector<16x128xf32>
    %4 = arith.truncf %3 : vector<16x128xf32> to vector<16x128xbf16>
    %c0_2 = arith.constant 0 : index
    %c0_3 = arith.constant 0 : index
    %c0_4 = arith.constant 0 : index
    %5 = vector.load %arg6[%c0_2, %c0_3, %c0_4] : memref<1x128x384xbf16, #tpu.memory_space<vmem>>, vector<1x128x384xbf16>
    %6 = vector.shape_cast %5 : vector<1x128x384xbf16> to vector<128x384xbf16>
    %cst = arith.constant dense<0.000000e+00> : vector<16x384xf32>
    %7 = tpu.matmul %4, %6, %cst {dimension_numbers = #tpu.dot_dimension_numbers<[1], [0], [0], [1], [0, 0, 1, 1], [], []>} : vector<16x128xbf16>, vector<128x384xbf16>, vector<16x384xf32> -> vector<16x384xf32>
    %c0_5 = arith.constant 0 : index
    %c0_6 = arith.constant 0 : index
    %c0_7 = arith.constant 0 : index
    %8 = vector.load %arg7[%c0_5, %c0_6, %c0_7] : memref<1x1x384xf32, #tpu.memory_space<vmem>>, vector<1x1x384xf32>
    %9 = vector.shape_cast %8 : vector<1x1x384xf32> to vector<1x384xf32>
    %10 = vector.broadcast %9 : vector<1x384xf32> to vector<16x384xf32>
    %11 = arith.addf %7, %10 : vector<16x384xf32>
    %c0_8 = arith.constant 0 : index
    %c0_9 = arith.constant 0 : index
    %c0_10 = arith.constant 0 : index
    %12 = vector.load %arg3[%c0_8, %c0_9, %c0_10] : memref<1x16x16xf32, #tpu.memory_space<vmem>>, vector<1x16x16xf32>
    %13 = vector.shape_cast %12 : vector<1x16x16xf32> to vector<16x16xf32>
    %14 = vector.extract_strided_slice %11 {offsets = [0, 0], sizes = [16, 64], strides = [1, 1]} : vector<16x384xf32> to vector<16x64xf32>
    %15 = arith.truncf %14 : vector<16x64xf32> to vector<16x64xbf16>
    %16 = vector.extract_strided_slice %11 {offsets = [0, 128], sizes = [16, 64], strides = [1, 1]} : vector<16x384xf32> to vector<16x64xf32>
    %17 = arith.truncf %16 : vector<16x64xf32> to vector<16x64xbf16>
    %18 = vector.extract_strided_slice %11 {offsets = [0, 256], sizes = [16, 64], strides = [1, 1]} : vector<16x384xf32> to vector<16x64xf32>
    %19 = arith.truncf %18 : vector<16x64xf32> to vector<16x64xbf16>
    %cst_11 = arith.constant dense<0.000000e+00> : vector<16x16xf32>
    %20 = tpu.matmul %15, %17, %cst_11 {dimension_numbers = #tpu.dot_dimension_numbers<[1], [1], [0], [0], [0, 0, 1, 0], [], []>} : vector<16x64xbf16>, vector<16x64xbf16>, vector<16x16xf32> -> vector<16x16xf32>
    %cst_12 = arith.constant 1.250000e-01 : f32
    %21 = vector.broadcast %cst_12 : f32 to vector<16x16xf32>
    %22 = arith.mulf %20, %21 : vector<16x16xf32>
    %23 = arith.addf %22, %13 : vector<16x16xf32>
    %cst_13 = arith.constant dense<0xFF800000> : vector<16xf32>
    %24 = vector.multi_reduction <maximumf>, %23, %cst_13 [1] : vector<16x16xf32> to vector<16xf32>
    %25 = vector.shape_cast %24 : vector<16xf32> to vector<16x1xf32>
    %26 = vector.broadcast %25 : vector<16x1xf32> to vector<16x16xf32>
    %27 = arith.subf %23, %26 : vector<16x16xf32>
    %28 = math.exp %27 : vector<16x16xf32>
    %cst_14 = arith.constant dense<0.000000e+00> : vector<16xf32>
    %29 = vector.multi_reduction <add>, %28, %cst_14 [1] : vector<16x16xf32> to vector<16xf32>
    %30 = vector.shape_cast %29 : vector<16xf32> to vector<16x1xf32>
    %31 = tpu.reciprocal %30 {approx = true} : vector<16x1xf32> -> vector<16x1xf32>
    %32 = vector.broadcast %31 : vector<16x1xf32> to vector<16x16xf32>
    %33 = arith.mulf %28, %32 : vector<16x16xf32>
    %34 = arith.truncf %33 : vector<16x16xf32> to vector<16x16xbf16>
    %cst_15 = arith.constant dense<0.000000e+00> : vector<16x64xf32>
    %35 = tpu.matmul %34, %19, %cst_15 {dimension_numbers = #tpu.dot_dimension_numbers<[1], [0], [0], [1], [0, 0, 1, 1], [], []>} : vector<16x16xbf16>, vector<16x64xbf16>, vector<16x64xf32> -> vector<16x64xf32>
    %36 = vector.extract_strided_slice %11 {offsets = [0, 64], sizes = [16, 64], strides = [1, 1]} : vector<16x384xf32> to vector<16x64xf32>
    %37 = arith.truncf %36 : vector<16x64xf32> to vector<16x64xbf16>
    %38 = vector.extract_strided_slice %11 {offsets = [0, 192], sizes = [16, 64], strides = [1, 1]} : vector<16x384xf32> to vector<16x64xf32>
    %39 = arith.truncf %38 : vector<16x64xf32> to vector<16x64xbf16>
    %40 = vector.extract_strided_slice %11 {offsets = [0, 320], sizes = [16, 64], strides = [1, 1]} : vector<16x384xf32> to vector<16x64xf32>
    %41 = arith.truncf %40 : vector<16x64xf32> to vector<16x64xbf16>
    %cst_16 = arith.constant dense<0.000000e+00> : vector<16x16xf32>
    %42 = tpu.matmul %37, %39, %cst_16 {dimension_numbers = #tpu.dot_dimension_numbers<[1], [1], [0], [0], [0, 0, 1, 0], [], []>} : vector<16x64xbf16>, vector<16x64xbf16>, vector<16x16xf32> -> vector<16x16xf32>
    %cst_17 = arith.constant 1.250000e-01 : f32
    %43 = vector.broadcast %cst_17 : f32 to vector<16x16xf32>
    %44 = arith.mulf %42, %43 : vector<16x16xf32>
    %45 = arith.addf %44, %13 : vector<16x16xf32>
    %cst_18 = arith.constant dense<0xFF800000> : vector<16xf32>
    %46 = vector.multi_reduction <maximumf>, %45, %cst_18 [1] : vector<16x16xf32> to vector<16xf32>
    %47 = vector.shape_cast %46 : vector<16xf32> to vector<16x1xf32>
    %48 = vector.broadcast %47 : vector<16x1xf32> to vector<16x16xf32>
    %49 = arith.subf %45, %48 : vector<16x16xf32>
    %50 = math.exp %49 : vector<16x16xf32>
    %cst_19 = arith.constant dense<0.000000e+00> : vector<16xf32>
    %51 = vector.multi_reduction <add>, %50, %cst_19 [1] : vector<16x16xf32> to vector<16xf32>
    %52 = vector.shape_cast %51 : vector<16xf32> to vector<16x1xf32>
    %53 = tpu.reciprocal %52 {approx = true} : vector<16x1xf32> -> vector<16x1xf32>
    %54 = vector.broadcast %53 : vector<16x1xf32> to vector<16x16xf32>
    %55 = arith.mulf %50, %54 : vector<16x16xf32>
    %56 = arith.truncf %55 : vector<16x16xf32> to vector<16x16xbf16>
    %cst_20 = arith.constant dense<0.000000e+00> : vector<16x64xf32>
    %57 = tpu.matmul %56, %41, %cst_20 {dimension_numbers = #tpu.dot_dimension_numbers<[1], [0], [0], [1], [0, 0, 1, 1], [], []>} : vector<16x16xbf16>, vector<16x64xbf16>, vector<16x64xf32> -> vector<16x64xf32>
    %58 = tpu.concatenate %35, %57 in 1 : vector<16x64xf32>, vector<16x64xf32> -> vector<16x128xf32>
    %59 = arith.truncf %58 : vector<16x128xf32> to vector<16x128xbf16>
    %c0_21 = arith.constant 0 : index
    %c0_22 = arith.constant 0 : index
    %c0_23 = arith.constant 0 : index
    %60 = vector.load %arg8[%c0_21, %c0_22, %c0_23] : memref<1x128x128xbf16, #tpu.memory_space<vmem>>, vector<1x128x128xbf16>
    %61 = vector.shape_cast %60 : vector<1x128x128xbf16> to vector<128x128xbf16>
    %cst_24 = arith.constant dense<0.000000e+00> : vector<16x128xf32>
    %62 = tpu.matmul %59, %61, %cst_24 {dimension_numbers = #tpu.dot_dimension_numbers<[1], [0], [0], [1], [0, 0, 1, 1], [], []>} : vector<16x128xbf16>, vector<128x128xbf16>, vector<16x128xf32> -> vector<16x128xf32>
    %c0_25 = arith.constant 0 : index
    %c0_26 = arith.constant 0 : index
    %c0_27 = arith.constant 0 : index
    %63 = vector.load %arg9[%c0_25, %c0_26, %c0_27] : memref<1x1x128xf32, #tpu.memory_space<vmem>>, vector<1x1x128xf32>
    %64 = vector.shape_cast %63 : vector<1x1x128xf32> to vector<1x128xf32>
    %65 = vector.broadcast %64 : vector<1x128xf32> to vector<16x128xf32>
    %66 = arith.addf %62, %65 : vector<16x128xf32>
    %67 = arith.addf %3, %66 : vector<16x128xf32>
    %c0_28 = arith.constant 0 : index
    %c0_29 = arith.constant 0 : index
    %c0_30 = arith.constant 0 : index
    %68 = vector.load %arg10[%c0_28, %c0_29, %c0_30] : memref<1x1x128xf32, #tpu.memory_space<vmem>>, vector<1x1x128xf32>
    %69 = vector.shape_cast %68 : vector<1x1x128xf32> to vector<1x128xf32>
    %c0_31 = arith.constant 0 : index
    %c0_32 = arith.constant 0 : index
    %c0_33 = arith.constant 0 : index
    %70 = vector.load %arg11[%c0_31, %c0_32, %c0_33] : memref<1x1x128xf32, #tpu.memory_space<vmem>>, vector<1x1x128xf32>
    %71 = vector.shape_cast %70 : vector<1x1x128xf32> to vector<1x128xf32>
    %cst_34 = arith.constant dense<0.000000e+00> : vector<16xf32>
    %72 = vector.multi_reduction <add>, %67, %cst_34 [1] : vector<16x128xf32> to vector<16xf32>
    %73 = vector.shape_cast %72 : vector<16xf32> to vector<16x1xf32>
    %cst_35 = arith.constant 1.280000e+02 : f32
    %74 = vector.broadcast %cst_35 : f32 to vector<16x1xf32>
    %75 = arith.divf %73, %74 : vector<16x1xf32>
    %76 = vector.broadcast %75 : vector<16x1xf32> to vector<16x128xf32>
    %77 = arith.subf %67, %76 : vector<16x128xf32>
    %78 = arith.mulf %77, %77 : vector<16x128xf32>
    %cst_36 = arith.constant dense<0.000000e+00> : vector<16xf32>
    %79 = vector.multi_reduction <add>, %78, %cst_36 [1] : vector<16x128xf32> to vector<16xf32>
    %80 = vector.shape_cast %79 : vector<16xf32> to vector<16x1xf32>
    %cst_37 = arith.constant 1.280000e+02 : f32
    %81 = vector.broadcast %cst_37 : f32 to vector<16x1xf32>
    %82 = arith.divf %80, %81 : vector<16x1xf32>
    %83 = vector.broadcast %75 : vector<16x1xf32> to vector<16x128xf32>
    %84 = arith.subf %67, %83 : vector<16x128xf32>
    %cst_38 = arith.constant 9.99999996E-13 : f32
    %85 = vector.broadcast %cst_38 : f32 to vector<16x1xf32>
    %86 = arith.addf %82, %85 : vector<16x1xf32>
    %87 = math.rsqrt %86 : vector<16x1xf32>
    %88 = vector.broadcast %87 : vector<16x1xf32> to vector<16x128xf32>
    %89 = arith.mulf %84, %88 : vector<16x128xf32>
    %90 = vector.broadcast %69 : vector<1x128xf32> to vector<16x128xf32>
    %91 = arith.mulf %89, %90 : vector<16x128xf32>
    %92 = vector.broadcast %71 : vector<1x128xf32> to vector<16x128xf32>
    %93 = arith.addf %91, %92 : vector<16x128xf32>
    %94 = arith.truncf %93 : vector<16x128xf32> to vector<16x128xbf16>
    %c0_39 = arith.constant 0 : index
    %c0_40 = arith.constant 0 : index
    %c0_41 = arith.constant 0 : index
    %95 = vector.load %arg12[%c0_39, %c0_40, %c0_41] : memref<1x128x256xbf16, #tpu.memory_space<vmem>>, vector<1x128x256xbf16>
    %96 = vector.shape_cast %95 : vector<1x128x256xbf16> to vector<128x256xbf16>
    %cst_42 = arith.constant dense<0.000000e+00> : vector<16x256xf32>
    %97 = tpu.matmul %94, %96, %cst_42 {dimension_numbers = #tpu.dot_dimension_numbers<[1], [0], [0], [1], [0, 0, 1, 1], [], []>} : vector<16x128xbf16>, vector<128x256xbf16>, vector<16x256xf32> -> vector<16x256xf32>
    %c0_43 = arith.constant 0 : index
    %c0_44 = arith.constant 0 : index
    %c0_45 = arith.constant 0 : index
    %98 = vector.load %arg13[%c0_43, %c0_44, %c0_45] : memref<1x1x256xf32, #tpu.memory_space<vmem>>, vector<1x1x256xf32>
    %99 = vector.shape_cast %98 : vector<1x1x256xf32> to vector<1x256xf32>
    %100 = vector.broadcast %99 : vector<1x256xf32> to vector<16x256xf32>
    %101 = arith.addf %97, %100 : vector<16x256xf32>
    %cst_46 = arith.constant 5.000000e-01 : f32
    %102 = vector.broadcast %cst_46 : f32 to vector<16x256xf32>
    %103 = arith.mulf %102, %101 : vector<16x256xf32>
    %cst_47 = arith.constant 0.707106769 : f32
    %104 = vector.broadcast %cst_47 : f32 to vector<16x256xf32>
    %105 = arith.mulf %101, %104 : vector<16x256xf32>
    %106 = math.erf %105 : vector<16x256xf32>
    %cst_48 = arith.constant 1.000000e+00 : f32
    %107 = vector.broadcast %cst_48 : f32 to vector<16x256xf32>
    %108 = arith.addf %107, %106 : vector<16x256xf32>
    %109 = arith.mulf %103, %108 : vector<16x256xf32>
    %110 = arith.truncf %109 : vector<16x256xf32> to vector<16x256xbf16>
    %c0_49 = arith.constant 0 : index
    %c0_50 = arith.constant 0 : index
    %c0_51 = arith.constant 0 : index
    %111 = vector.load %arg14[%c0_49, %c0_50, %c0_51] : memref<1x256x128xbf16, #tpu.memory_space<vmem>>, vector<1x256x128xbf16>
    %112 = vector.shape_cast %111 : vector<1x256x128xbf16> to vector<256x128xbf16>
    %cst_52 = arith.constant dense<0.000000e+00> : vector<16x128xf32>
    %113 = tpu.matmul %110, %112, %cst_52 {dimension_numbers = #tpu.dot_dimension_numbers<[1], [0], [0], [1], [0, 0, 1, 1], [], []>} : vector<16x256xbf16>, vector<256x128xbf16>, vector<16x128xf32> -> vector<16x128xf32>
    %c0_53 = arith.constant 0 : index
    %c0_54 = arith.constant 0 : index
    %c0_55 = arith.constant 0 : index
    %114 = vector.load %arg15[%c0_53, %c0_54, %c0_55] : memref<1x1x128xf32, #tpu.memory_space<vmem>>, vector<1x1x128xf32>
    %115 = vector.shape_cast %114 : vector<1x1x128xf32> to vector<1x128xf32>
    %116 = vector.broadcast %115 : vector<1x128xf32> to vector<16x128xf32>
    %117 = arith.addf %113, %116 : vector<16x128xf32>
    %118 = arith.addf %93, %117 : vector<16x128xf32>
    %c0_56 = arith.constant 0 : index
    %c0_57 = arith.constant 0 : index
    %c0_58 = arith.constant 0 : index
    %119 = vector.load %arg16[%c0_56, %c0_57, %c0_58] : memref<1x1x128xf32, #tpu.memory_space<vmem>>, vector<1x1x128xf32>
    %120 = vector.shape_cast %119 : vector<1x1x128xf32> to vector<1x128xf32>
    %c0_59 = arith.constant 0 : index
    %c0_60 = arith.constant 0 : index
    %c0_61 = arith.constant 0 : index
    %121 = vector.load %arg17[%c0_59, %c0_60, %c0_61] : memref<1x1x128xf32, #tpu.memory_space<vmem>>, vector<1x1x128xf32>
    %122 = vector.shape_cast %121 : vector<1x1x128xf32> to vector<1x128xf32>
    %cst_62 = arith.constant dense<0.000000e+00> : vector<16xf32>
    %123 = vector.multi_reduction <add>, %118, %cst_62 [1] : vector<16x128xf32> to vector<16xf32>
    %124 = vector.shape_cast %123 : vector<16xf32> to vector<16x1xf32>
    %cst_63 = arith.constant 1.280000e+02 : f32
    %125 = vector.broadcast %cst_63 : f32 to vector<16x1xf32>
    %126 = arith.divf %124, %125 : vector<16x1xf32>
    %127 = vector.broadcast %126 : vector<16x1xf32> to vector<16x128xf32>
    %128 = arith.subf %118, %127 : vector<16x128xf32>
    %129 = arith.mulf %128, %128 : vector<16x128xf32>
    %cst_64 = arith.constant dense<0.000000e+00> : vector<16xf32>
    %130 = vector.multi_reduction <add>, %129, %cst_64 [1] : vector<16x128xf32> to vector<16xf32>
    %131 = vector.shape_cast %130 : vector<16xf32> to vector<16x1xf32>
    %cst_65 = arith.constant 1.280000e+02 : f32
    %132 = vector.broadcast %cst_65 : f32 to vector<16x1xf32>
    %133 = arith.divf %131, %132 : vector<16x1xf32>
    %134 = vector.broadcast %126 : vector<16x1xf32> to vector<16x128xf32>
    %135 = arith.subf %118, %134 : vector<16x128xf32>
    %cst_66 = arith.constant 9.99999996E-13 : f32
    %136 = vector.broadcast %cst_66 : f32 to vector<16x1xf32>
    %137 = arith.addf %133, %136 : vector<16x1xf32>
    %138 = math.rsqrt %137 : vector<16x1xf32>
    %139 = vector.broadcast %138 : vector<16x1xf32> to vector<16x128xf32>
    %140 = arith.mulf %135, %139 : vector<16x128xf32>
    %141 = vector.broadcast %120 : vector<1x128xf32> to vector<16x128xf32>
    %142 = arith.mulf %140, %141 : vector<16x128xf32>
    %143 = vector.broadcast %122 : vector<1x128xf32> to vector<16x128xf32>
    %144 = arith.addf %142, %143 : vector<16x128xf32>
    %c0_67 = arith.constant 0 : index
    %c0_68 = arith.constant 0 : index
    %145 = vector.load %arg21[%c0_67, %c0_68] : memref<16x128xf32, #tpu.memory_space<vmem>>, vector<16x128xf32>
    tpu.vector_store %arg21[%c0_67, %c0_68], %144 {strides = array<i32>} : memref<16x128xf32, #tpu.memory_space<vmem>>, vector<16x128xf32>,
    %c1_i32 = arith.constant 1 : i32
    %146 = arith.cmpi eq, %arg1, %c1_i32 : i32
    %147 = arith.extui %146 : i1 to i32
    %c0_i32_69 = arith.constant 0 : i32
    %148 = arith.cmpi ne, %147, %c0_i32_69 : i32
    scf.if %148 {
      %149 = arith.truncf %144 : vector<16x128xf32> to vector<16x128xbf16>
      %c0_70 = arith.constant 0 : index
      %c0_71 = arith.constant 0 : index
      %150 = vector.load %arg18[%c0_70, %c0_71] : memref<128x128xbf16, #tpu.memory_space<vmem>>, vector<128x128xbf16>
      %cst_72 = arith.constant dense<0.000000e+00> : vector<16x128xf32>
      %151 = tpu.matmul %149, %150, %cst_72 {dimension_numbers = #tpu.dot_dimension_numbers<[1], [0], [0], [1], [0, 0, 1, 1], [], []>} : vector<16x128xbf16>, vector<128x128xbf16>, vector<16x128xf32> -> vector<16x128xf32>
      %c0_73 = arith.constant 0 : index
      %c0_74 = arith.constant 0 : index
      %152 = vector.load %arg19[%c0_73, %c0_74] : memref<1x128xf32, #tpu.memory_space<vmem>>, vector<1x128xf32>
      %153 = vector.broadcast %152 : vector<1x128xf32> to vector<16x128xf32>
      %154 = arith.addf %151, %153 : vector<16x128xf32>
      %c0_75 = arith.constant 0 : index
      %c0_76 = arith.constant 0 : index
      %155 = vector.load %arg20[%c0_75, %c0_76] : memref<16x128xf32, #tpu.memory_space<vmem>>, vector<16x128xf32>
      tpu.vector_store %arg20[%c0_75, %c0_76], %154 {strides = array<i32>} : memref<16x128xf32, #tpu.memory_space<vmem>>, vector<16x128xf32>,
    } else {
    }
    return
  }
  func.func @transform_0(%arg0: i32, %arg1: i32) -> (i32, i32) {
    %c0_i32 = arith.constant 0 : i32
    %c0_i32_0 = arith.constant 0 : i32
    return %arg0, %c0_i32 : i32, i32
  }
  func.func @transform_1(%arg0: i32, %arg1: i32) -> (i32, i32, i32) {
    %c0_i32 = arith.constant 0 : i32
    %c0_i32_0 = arith.constant 0 : i32
    %c0_i32_1 = arith.constant 0 : i32
    return %arg0, %c0_i32, %c0_i32_0 : i32, i32, i32
  }
  func.func @transform_2(%arg0: i32, %arg1: i32) -> (i32, i32) {
    %c0_i32 = arith.constant 0 : i32
    %c0_i32_0 = arith.constant 0 : i32
    %c0_i32_1 = arith.constant 0 : i32
    return %c0_i32, %c0_i32_0 : i32, i32
  }
  func.func @transform_3(%arg0: i32, %arg1: i32) -> (i32, i32) {
    %c0_i32 = arith.constant 0 : i32
    %c0_i32_0 = arith.constant 0 : i32
    %c0_i32_1 = arith.constant 0 : i32
    return %c0_i32, %c0_i32_0 : i32, i32
  }
  func.func @transform_4(%arg0: i32, %arg1: i32) -> (i32, i32, i32) {
    %c0_i32 = arith.constant 0 : i32
    %c0_i32_0 = arith.constant 0 : i32
    %c0_i32_1 = arith.constant 0 : i32
    return %arg1, %c0_i32, %c0_i32_0 : i32, i32, i32
  }
  func.func @transform_5(%arg0: i32, %arg1: i32) -> (i32, i32, i32) {
    %c0_i32 = arith.constant 0 : i32
    %c0_i32_0 = arith.constant 0 : i32
    %c0_i32_1 = arith.constant 0 : i32
    return %arg1, %c0_i32, %c0_i32_0 : i32, i32, i32
  }
  func.func @transform_6(%arg0: i32, %arg1: i32) -> (i32, i32, i32) {
    %c0_i32 = arith.constant 0 : i32
    %c0_i32_0 = arith.constant 0 : i32
    %c0_i32_1 = arith.constant 0 : i32
    return %arg1, %c0_i32, %c0_i32_0 : i32, i32, i32
  }
  func.func @transform_7(%arg0: i32, %arg1: i32) -> (i32, i32, i32) {
    %c0_i32 = arith.constant 0 : i32
    %c0_i32_0 = arith.constant 0 : i32
    %c0_i32_1 = arith.constant 0 : i32
    return %arg1, %c0_i32, %c0_i32_0 : i32, i32, i32
  }
  func.func @transform_8(%arg0: i32, %arg1: i32) -> (i32, i32, i32) {
    %c0_i32 = arith.constant 0 : i32
    %c0_i32_0 = arith.constant 0 : i32
    %c0_i32_1 = arith.constant 0 : i32
    return %arg1, %c0_i32, %c0_i32_0 : i32, i32, i32
  }
  func.func @transform_9(%arg0: i32, %arg1: i32) -> (i32, i32, i32) {
    %c0_i32 = arith.constant 0 : i32
    %c0_i32_0 = arith.constant 0 : i32
    %c0_i32_1 = arith.constant 0 : i32
    return %arg1, %c0_i32, %c0_i32_0 : i32, i32, i32
  }
  func.func @transform_10(%arg0: i32, %arg1: i32) -> (i32, i32, i32) {
    %c0_i32 = arith.constant 0 : i32
    %c0_i32_0 = arith.constant 0 : i32
    %c0_i32_1 = arith.constant 0 : i32
    return %arg1, %c0_i32, %c0_i32_0 : i32, i32, i32
  }
  func.func @transform_11(%arg0: i32, %arg1: i32) -> (i32, i32, i32) {
    %c0_i32 = arith.constant 0 : i32
    %c0_i32_0 = arith.constant 0 : i32
    %c0_i32_1 = arith.constant 0 : i32
    return %arg1, %c0_i32, %c0_i32_0 : i32, i32, i32
  }
  func.func @transform_12(%arg0: i32, %arg1: i32) -> (i32, i32, i32) {
    %c0_i32 = arith.constant 0 : i32
    %c0_i32_0 = arith.constant 0 : i32
    %c0_i32_1 = arith.constant 0 : i32
    return %arg1, %c0_i32, %c0_i32_0 : i32, i32, i32
  }
  func.func @transform_13(%arg0: i32, %arg1: i32) -> (i32, i32, i32) {
    %c0_i32 = arith.constant 0 : i32
    %c0_i32_0 = arith.constant 0 : i32
    %c0_i32_1 = arith.constant 0 : i32
    return %arg1, %c0_i32, %c0_i32_0 : i32, i32, i32
  }
  func.func @transform_14(%arg0: i32, %arg1: i32) -> (i32, i32, i32) {
    %c0_i32 = arith.constant 0 : i32
    %c0_i32_0 = arith.constant 0 : i32
    %c0_i32_1 = arith.constant 0 : i32
    return %arg1, %c0_i32, %c0_i32_0 : i32, i32, i32
  }
  func.func @transform_15(%arg0: i32, %arg1: i32) -> (i32, i32, i32) {
    %c0_i32 = arith.constant 0 : i32
    %c0_i32_0 = arith.constant 0 : i32
    %c0_i32_1 = arith.constant 0 : i32
    return %arg1, %c0_i32, %c0_i32_0 : i32, i32, i32
  }
  func.func @transform_16(%arg0: i32, %arg1: i32) -> (i32, i32) {
    %c0_i32 = arith.constant 0 : i32
    %c0_i32_0 = arith.constant 0 : i32
    %c0_i32_1 = arith.constant 0 : i32
    return %c0_i32, %c0_i32_0 : i32, i32
  }
  func.func @transform_17(%arg0: i32, %arg1: i32) -> (i32, i32) {
    %c0_i32 = arith.constant 0 : i32
    %c0_i32_0 = arith.constant 0 : i32
    %c0_i32_1 = arith.constant 0 : i32
    return %c0_i32, %c0_i32_0 : i32, i32
  }
  func.func @transform_18(%arg0: i32, %arg1: i32) -> (i32, i32) {
    %c0_i32 = arith.constant 0 : i32
    %c0_i32_0 = arith.constant 0 : i32
    return %arg0, %c0_i32 : i32, i32
  }
}

</mosaic_0001>

<bundles_post_ra>
// kernel: neurond_bert_multitask_forward.1
= control target key start
LH: loop header
LB: loop body
LE: loop exit
PB: predicated region body
PF: predicated region fallthrough
CT: control target
= control target key end

     0   :  { %s3923_s0 = inlined_call_operand.vmem [shape: f32[16,128], index: 0, kind: input, shape index: {}]   ;;  %s3924_s1 = inlined_call_operand.vmem [shape: f32[1,16,16], index: 1, kind: input, shape index: {}]   ;;  %s3925_s2 = inlined_call_operand.hbm [shape: f32[1,128], index: 2, kind: input, shape index: {}]   ;;  %s3926_s3 = inlined_call_operand.hbm [shape: f32[1,128], index: 3, kind: input, shape index: {}]   ;;  %s3927_s4 = inlined_call_operand.hbm [shape: bf16[2,128,384], index: 4, kind: input, shape index: {}]   ;;  %s3928_s5 = inlined_call_operand.vmem [shape: f32[2,1,384], index: 5, kind: input, shape index: {}]   ;;  %s3929_s6 = inlined_call_operand.hbm [shape: bf16[2,128,128], index: 6, kind: input, shape index: {}]   ;;  %s3930_s7 = inlined_call_operand.vmem [shape: f32[2,1,128], index: 7, kind: input, shape index: {}]   ;;  %s3931_s8 = inlined_call_operand.vmem [shape: f32[2,1,128], index: 8, kind: input, shape index: {}]   ;;  %s3932_s9 = inlined_call_operand.hbm [shape: f32[2,1,128], index: 9, kind: input, shape index: {}]   ;;  %s3933_s10 = inlined_call_operand.vmem [shape: bf16[2,128,256], index: 10, kind: input, shape index: {}]   ;;  %s3934_s11 = inlined_call_operand.vmem [shape: f32[2,1,256], index: 11, kind: input, shape index: {}]   ;;  %s3935_s12 = inlined_call_operand.hbm [shape: bf16[2,256,128], index: 12, kind: input, shape index: {}]   ;;  %s3936_s13 = inlined_call_operand.hbm [shape: f32[2,1,128], index: 13, kind: input, shape index: {}]   ;;  %s3937_s14 = inlined_call_operand.vmem [shape: f32[2,1,128], index: 14, kind: input, shape index: {}]   ;;  %s3938_s15 = inlined_call_operand.hbm [shape: f32[2,1,128], index: 15, kind: input, shape index: {}]   ;;  %s3939_s16 = inlined_call_operand.vmem [shape: bf16[128,128], index: 16, kind: input, shape index: {}]   ;;  %s3940_s17 = inlined_call_operand.hbm [shape: f32[1,128], index: 17, kind: input, shape index: {}]   ;;  %s3941_s18 = inlined_call_operand.vmem [shape: f32[16,128], index: 18, kind: output, shape index: {}]  }
   0x1   :  { %3958 = sst [smem:[#allocation24_spill]] %s3923_s0 }
   0x2   :  { %3959 = sst [smem:[#allocation25_spill]] %s3924_s1 }
   0x3   :  { %3960 = sst [smem:[#allocation26_spill]] %s3925_s2 }
   0x4   :  { %3961 = sst [smem:[#allocation27_spill]] %s3926_s3 }
   0x5   :  { %3962 = sst [smem:[#allocation28_spill]] %s3927_s4 }
   0x6   :  { %3963 = sst [smem:[#allocation29_spill]] %s3928_s5 }
   0x7   :  { %3964 = sst [smem:[#allocation30_spill]] %s3929_s6 }
   0x8   :  { %3965 = sst [smem:[#allocation31_spill]] %s3930_s7 }
   0x9   :  { %3966 = sst [smem:[#allocation32_spill]] %s3931_s8 }
   0xa   :  { %3967 = sst [smem:[#allocation33_spill]] %s3932_s9 }
   0xb   :  { %3968 = sst [smem:[#allocation34_spill]] %s3933_s10 }
   0xc   :  { %3969 = sst [smem:[#allocation35_spill]] %s3934_s11 }
   0xd   :  { %3970 = sst [smem:[#allocation36_spill]] %s3935_s12 }
   0xe   :  { %3971 = sst [smem:[#allocation37_spill]] %s3936_s13 }
   0xf   :  { %3972 = sst [smem:[#allocation38_spill]] %s3937_s14 }
  0x10   :  { %3973 = sst [smem:[#allocation39_spill]] %s3939_s16 }
  0x11   :  { %3974 = sst [smem:[#allocation40_spill]] %s3941_s18 }
  0x12   :  { %23 = vsyncpa [#allocation4], 0 }
  0x13   :  { %24 = vsyncpa [#allocation6], 0  ;;  %s3420_s27 = smov 0   ;;  %s3422_s28 = smov 0  }
  0x14   :  { %s3424_s29 = smov 0   ;;  %s3426_s30 = smov 0  }
  0x15   :  { %s3428_s0 = smov 0   ;;  %s3430_s19 = smov 0  }
  0x16 LB: > { %3975 = sst [smem:[#allocation18_spill]] %s3288_s28  ;;  %s3944_s1 = sadd.s32 4294967295, %s3304_s19   ;;  %s3304_s19 = sphi %s3430_s19, %s30_s19   ;;  %s3300_s0 = sphi %s3428_s0, %s4027_s0   ;;  %s3296_s30 = sphi %s3426_s30, %s4026_s30   ;;  %s3292_s29 = sphi %s3424_s29, %s4024_s29   ;;  %s3288_s28 = sphi %s3422_s28, %s4023_s28   ;;  %s3284_s27 = sphi %s3420_s27, %s4022_s27  }
  0x17   : > { %3976 = sst [smem:[#allocation19_spill]] %s3292_s29  ;;  %p150_p0 = scmp.ne.s32.totalorder %s3292_s29, %s3288_s28 }
  0x18   : > { %3977 = sst [smem:[#allocation20_spill]] %s3296_s30  ;;  %p151_p1 = scmp.eq.s32.totalorder %s3304_s19, 0 }
  0x19   : > { %p156_p2 = scmp.ne.s32.totalorder %s3288_s28, %s3284_s27  ;;  %p3456_p3 = scmp.eq.s32.totalorder %s3944_s1, 0 }
  0x1a   : > { %p152_p4 = por %p151_p1, %p150_p0  ;;  %p2481_p5 = scmp.ge.s32.totalorder %s3304_s19, 1 }
  0x1b   : > { %s3978_s21 = scalar_select %p3456_p3, 1, 0 }
  0x1c   : > { %p3463_p6 = por %p3456_p3, %p156_p2  ;;  %p521_p7 = scmp.lt.s32.totalorder %s3304_s19, 3 }
  0x1d   : > { %s3306_s23 = smov [#allocation3]   ;;  %p2802_p10 = scmp.lt.s32.totalorder %s3304_s19, 2 }
  0x1e   : > { %s3979_s22 = scalar_select %p3463_p6, 1, 0 }
  0x1f   : > { %p3468_p8 = pnand %p2481_p5, %p521_p7  ;;  %s551_s24 = sshll.u32 %s3306_s23, 4  ;;  %s552_s24 = int_to_ptr.vmem [resolvable:$true] %s551_s24 }
  0x20   : > { %3980 = sst [smem:[#allocation21_spill]] %s3979_s22  ;;  %p3482_p12 = pnand %p2802_p10, %p152_p4 }
  0x21   : > { %p2770_p9 = pneg %p3468_p8  ;;  %s3007_s1 = scalar_lea.vmem %s552_s24, 16 }
  0x22   : > { %p3008_p0 = scmp.ne.s32.totalorder %s552_s24, %s3007_s1  ;;  %s3014_s23 = scalar_lea.vmem %s552_s24, 32 }
  0x23   : > { %p3478_p11 = pnand %p2770_p9, %p3456_p3  ;;  %p3015_p5 = scmp.lt.s32.totalorder %s552_s24, %s552_s24 }
  0x24   : > { %p3016_p7 = scmp.lt.s32.totalorder %s3014_s23, %s3007_s1 }
  0x25   : > { %p2998_p13 = pneg %p3478_p11 }
  0x26   : > { %p3017_p9 = por %p3016_p7, %p3015_p5 }
  0x27   : > { %p3010_p1 = pnand %p3008_p0, %p2998_p13 }
  0x29   : > { %p3011_p2 = pneg %p3010_p1 }
  0x2b   : > { %p3018_p6 = pnand %p3017_p9, %p3011_p2 }
  0x2d   : > { %3021 = shalt.err (!%p3018_p6)
}
  0x2e   : > { %s3984_s18 = sld [smem:[#allocation26_spill]]  ;;  %s39_s16 = sadd.s32 1, %s3300_s0 }
  0x2f   : > { %s3498_s11 = sand.u32 1, %s3292_s29   ;;  %p40_p4 = scmp.ge.s32.totalorder %s39_s16, 2 }
  0x30   : > { %s2742_s1 = smul.u32 192, %s3498_s11  ;;  %s3986_s4 = sld [smem:[#allocation28_spill]] }
  0x31   : > { %s2743_s23 = smul.u32 3072, %s3300_s0  ;;  %s4029_s16 = smov (%p40_p4, %s39_s16), 0 }
  0x32   : > { %3985 = sst [smem:[#allocation22_spill]] %s4029_s16  ;;  %s140_s10 = ssub.s32 %s3300_s0, %s4029_s16 }
  0x33   : > { %s591_s5 = scalar_lea.vmem [#allocation7], %s2742_s1  ;;  %p141_p6 = scmp.eq.s32.totalorder %s140_s10, 0 }
  0x34   : > { %2773 = dma.hbm_to_vmem [thread:$0]  (!%p3478_p11), %s3984_s18, 16, %s552_s24, [#allocation4]  }
  0x35   : > { %s598_s18 = sshll.u32 %s591_s5, 4  ;;  %s2489_s24 = sshll.u32 %s3498_s11, 6  ;;  %s599_s18 = int_to_ptr.vmem [resolvable:$true] %s598_s18 }
  0x36   : > { %s3507_s14 = scalar_lea.hbm %s3986_s4, %s2743_s23  ;;  %s3987_s8 = sadd.s32 1, %s3292_s29 }
  0x37   : > { %s3515_s7 = scalar_select %p141_p6, %s3292_s29, %s3987_s8  }
  0x38   : > { %s3989_s30 = sand.u32 1, %s3304_s19   ;;  %p3523_p10 = pneg %p3482_p12 }
  0x39   : > { %3988 = sst [smem:[#allocation23_spill]] %s3515_s7  ;;  %s3519_s22 = scalar_lea.sflag [#allocation4], %s3989_s30 }
  0x3a   : > { %s3035_s23 = scalar_lea.vmem %s599_s18, 3072  ;;  %s3307_s5 = smov [#allocation7]  }
  0x3b   : > { %p3036_p0 = scmp.ne.s32.totalorder %s599_s18, %s3035_s23  ;;  %s3040_s10 = sshll.u32 %s3307_s5, 4  ;;  %s3041_s10 = int_to_ptr.vmem [resolvable:$false] %s3040_s10 }
  0x3c   : > { %s3042_s1 = scalar_lea.vmem %s3041_s10, 6144  ;;  %p3043_p5 = scmp.lt.s32.totalorder %s599_s18, %s3041_s10 }
  0x3d   : > { %p3038_p1 = pnand %p3036_p0, %p3523_p10  ;;  %p3044_p7 = scmp.lt.s32.totalorder %s3042_s1, %s3035_s23 }
  0x3f   : > { %p3039_p2 = pneg %p3038_p1  ;;  %p3045_p9 = por %p3044_p7, %p3043_p5 }
  0x41   : > { %p3046_p4 = pnand %p3045_p9, %p3039_p2 }
  0x43   : > { %3049 = shalt.err (!%p3046_p4)
}
  0x44   : > { %s3308_s8 = smov 192   ;;  %s3309_s30 = smov 12  }
  0x45   : > { %2783 = dma.hbm_to_vmem [thread:$0]  (!%p3482_p12), %s3507_s14, 3072, %s599_s18, %s3519_s22, %s3308_s8, %s3308_s8, %s3309_s30  }
  0x46   : > { %s2598_s20 = sshll.u32 %s3300_s0, 10  ;;  %s3991_s6 = sld [smem:[#allocation30_spill]] }
  0x47   : > { %s619_s16 = scalar_lea.vmem [#allocation8], %s2489_s24  ;;  %s3310_s1 = smov [#allocation8]  }
  0x48   : > { %s626_s10 = sshll.u32 %s619_s16, 4  ;;  %s3068_s7 = sshll.u32 %s3310_s1, 4  ;;  %s627_s10 = int_to_ptr.vmem [resolvable:$true] %s626_s10  ;;  %s3069_s7 = int_to_ptr.vmem [resolvable:$false] %s3068_s7 }
  0x49   : > { %s3063_s23 = scalar_lea.vmem %s627_s10, 1024  ;;  %s3070_s29 = scalar_lea.vmem %s3069_s7, 2048 }
  0x4a   : > { %p3064_p6 = scmp.ne.s32.totalorder %s627_s10, %s3063_s23  ;;  %p3071_p2 = scmp.lt.s32.totalorder %s627_s10, %s3069_s7 }
  0x4b   : > { %p3072_p5 = scmp.lt.s32.totalorder %s3070_s29, %s3063_s23 }
  0x4c   : > { %s625_s5 = scalar_lea.hbm %s3991_s6, %s2598_s20  ;;  %p3066_p0 = pnand %p3064_p6, %p3523_p10 }
  0x4d   : > { %p3073_p7 = por %p3072_p5, %p3071_p2 }
  0x4e   : > { %p3067_p1 = pneg %p3066_p0 }
  0x50   : > { %p3074_p9 = pnand %p3073_p7, %p3067_p1 }
  0x52   : > { %3077 = shalt.err (!%p3074_p9)
}
  0x53   : > { %s3954_s14 = smov 64   ;;  %s3955_s4 = smov 4  }
  0x54   : > { %2786 = dma.hbm_to_vmem [thread:$0]  (!%p3482_p12), %s625_s5, 1024, %s627_s10, %s3519_s22, %s3954_s14, %s3954_s14, %s3955_s4  }
  0x55   : > { %s3546_s16 = sshll.u32 %s3300_s0, 4  ;;  %s651_s7 = scalar_lea.vmem [#allocation9], %s3498_s11 }
  0x56   : > { %s658_s29 = sshll.u32 %s651_s7, 4  ;;  %s3992_s9 = sld [smem:[#allocation33_spill]]  ;;  %s659_s29 = int_to_ptr.vmem [resolvable:$true] %s658_s29 }
  0x57   : > { %s3091_s30 = scalar_lea.vmem %s659_s29, 16  ;;  %s3313_s20 = smov [#allocation9]  }
  0x58   : > { %p3092_p4 = scmp.ne.s32.totalorder %s659_s29, %s3091_s30  ;;  %s3096_s25 = sshll.u32 %s3313_s20, 4  ;;  %s3097_s25 = int_to_ptr.vmem [resolvable:$false] %s3096_s25 }
  0x59   : > { %s3098_s23 = scalar_lea.vmem %s3097_s25, 32  ;;  %p3099_p1 = scmp.lt.s32.totalorder %s659_s29, %s3097_s25 }
  0x5a   : > { %p3094_p6 = pnand %p3092_p4, %p3523_p10  ;;  %p3100_p2 = scmp.lt.s32.totalorder %s3098_s23, %s3091_s30 }
  0x5c   : > { %s656_s8 = scalar_lea.hbm %s3992_s9, %s3546_s16  ;;  %p3095_p0 = pneg %p3094_p6 }
  0x5d   : > { %p3101_p5 = por %p3100_p2, %p3099_p1 }
  0x5f   : > { %p3102_p7 = pnand %p3101_p5, %p3095_p0 }
  0x61   : > { %3105 = shalt.err (!%p3102_p7)
}
  0x62   : > { %2789 = dma.hbm_to_vmem [thread:$0]  (!%p3482_p12), %s656_s8, 16, %s659_s29, %s3519_s22  }
  0x63   : > { %s2493_s5 = sshll.u32 %s3498_s11, 7  ;;  %s2599_s10 = sshll.u32 %s3300_s0, 11 }
  0x64   : > { %s3993_s12 = sld [smem:[#allocation36_spill]]  ;;  %s684_s24 = scalar_lea.vmem [#allocation10], %s2493_s5 }
  0x65   : > { %s691_s20 = sshll.u32 %s684_s24, 4  ;;  %s3314_s30 = smov [#allocation5]   ;;  %s692_s20 = int_to_ptr.vmem [resolvable:$true] %s691_s20 }
  0x66   : > { %s562_s25 = sshll.u32 %s3314_s30, 4  ;;  %s3119_s23 = scalar_lea.vmem %s692_s20, 2048  ;;  %s563_s25 = int_to_ptr.vmem [resolvable:$true] %s562_s25 }
  0x67   : > { %p3120_p9 = scmp.ne.s32.totalorder %s692_s20, %s3119_s23  ;;  %s3315_s14 = smov [#allocation10]  }
  0x68   : > { %s3124_s4 = sshll.u32 %s3315_s14, 4  ;;  %s3125_s4 = int_to_ptr.vmem [resolvable:$false] %s3124_s4 }
  0x69   : > { %p3122_p4 = pnand %p3120_p9, %p3523_p10  ;;  %s3126_s29 = scalar_lea.vmem %s3125_s4, 4096 }
  0x6a   : > { %s690_s18 = scalar_lea.hbm %s3993_s12, %s2599_s10  ;;  %p3127_p0 = scmp.lt.s32.totalorder %s692_s20, %s3125_s4 }
  0x6b   : > { %p3123_p6 = pneg %p3122_p4  ;;  %p3128_p1 = scmp.lt.s32.totalorder %s3126_s29, %s3119_s23 }
  0x6d   : > { %p3129_p2 = por %p3128_p1, %p3127_p0 }
  0x6f   : > { %p3130_p5 = pnand %p3129_p2, %p3123_p6 }
  0x71   : > { %3133 = shalt.err (!%p3130_p5)
}
  0x72   : > { %s3994_s8 = smov 4   ;;  %s3995_s5 = smov 64  }
  0x73   : > { %2792 = dma.hbm_to_vmem [thread:$0]  (!%p3482_p12), %s690_s18, 2048, %s692_s20, %s3519_s22, %s3995_s5, %s3995_s5, %s3994_s8  }
  0x74   : > { %s3145_s10 = scalar_lea.vmem %s563_s25, 16  ;;  %s3152_s14 = scalar_lea.vmem %s563_s25, 32 }
  0x75   : > { %p3146_p7 = scmp.ne.s32.totalorder %s563_s25, %s3145_s10  ;;  %p3153_p3 = scmp.lt.s32.totalorder %s563_s25, %s563_s25 }
  0x76   : > { %p3154_p0 = scmp.lt.s32.totalorder %s3152_s14, %s3145_s10 }
  0x77   : > { %p3148_p9 = pnand %p3146_p7, %p2998_p13 }
  0x78   : > { %p3155_p6 = por %p3154_p0, %p3153_p3 }
  0x79   : > { %p3149_p4 = pneg %p3148_p9 }
  0x7b   : > { %p3156_p1 = pnand %p3155_p6, %p3149_p4 }
  0x7d   : > { %3159 = shalt.err (!%p3156_p1)
}
  0x7e   : > { %s3996_s3 = sld [smem:[#allocation27_spill]]  ;;  %s704_s20 = scalar_lea.vmem [#allocation11], %s3498_s11 }
  0x7f   : > { %s3997_s13 = sld [smem:[#allocation37_spill]]  ;;  %s711_s30 = sshll.u32 %s704_s20, 4  ;;  %s712_s30 = int_to_ptr.vmem [resolvable:$true] %s711_s30 }
  0x80   : > { %s3173_s23 = scalar_lea.vmem %s712_s30, 16  ;;  %s3316_s29 = smov [#allocation11]  }
  0x81   : > { %p3174_p3 = scmp.ne.s32.totalorder %s712_s30, %s3173_s23  ;;  %s3178_s8 = sshll.u32 %s3316_s29, 4  ;;  %s3179_s8 = int_to_ptr.vmem [resolvable:$false] %s3178_s8 }
  0x82   : > { %s3180_s5 = scalar_lea.vmem %s3179_s8, 32  ;;  %p3181_p7 = scmp.lt.s32.totalorder %s712_s30, %s3179_s8 }
  0x83   : > { %p3176_p2 = pnand %p3174_p3, %p3523_p10  ;;  %p3182_p9 = scmp.lt.s32.totalorder %s3180_s5, %s3173_s23 }
  0x84   : > { %2776 = dma.hbm_to_vmem [thread:$0]  (!%p3478_p11), %s3996_s3, 16, %s563_s25, [#allocation6]  }
  0x85   : > { %s709_s24 = scalar_lea.hbm %s3997_s13, %s3546_s16  ;;  %p3177_p5 = pneg %p3176_p2 }
  0x86   : > { %p3183_p4 = por %p3182_p9, %p3181_p7 }
  0x88   : > { %p3184_p0 = pnand %p3183_p4, %p3177_p5 }
  0x8a   : > { %3187 = shalt.err (!%p3184_p0)
}
  0x8b   : > { %2795 = dma.hbm_to_vmem [thread:$0]  (!%p3482_p12), %s709_s24, 16, %s712_s30, %s3519_s22  }
  0x8c   : > { %s3317_s25 = smov [#allocation13]   ;;  %s732_s1 = scalar_lea.hbm %s3938_s15, %s3546_s16 }
  0x8d   : > { %s576_s10 = sshll.u32 %s3317_s25, 4  ;;  %s577_s10 = int_to_ptr.vmem [resolvable:$true] %s576_s10 }
  0x8e   : > { %s3199_s7 = scalar_lea.vmem %s577_s10, 16  ;;  %s3206_s18 = scalar_lea.vmem %s577_s10, 32 }
  0x8f   : > { %p3200_p6 = scmp.ne.s32.totalorder %s577_s10, %s3199_s7  ;;  %p3207_p2 = scmp.lt.s32.totalorder %s577_s10, %s577_s10 }
  0x90   : > { %p3208_p5 = scmp.lt.s32.totalorder %s3206_s18, %s3199_s7 }
  0x91   : > { %p3202_p1 = pnand %p3200_p6, %p2998_p13 }
  0x92   : > { %p3209_p7 = por %p3208_p5, %p3207_p2 }
  0x93   : > { %p3203_p3 = pneg %p3202_p1 }
  0x95   : > { %p3210_p9 = pnand %p3209_p7, %p3203_p3 }
  0x97   : > { %3213 = shalt.err (!%p3210_p9)
}
  0x98   : > { %2779 = dma.hbm_to_vmem [thread:$0]  (!%p3478_p11), %s3940_s17, 16, %s577_s10, [#allocation6]  }
  0x99   : > { %s727_s30 = scalar_lea.vmem [#allocation12], %s3498_s11  ;;  %s3318_s8 = smov [#allocation12]  }
  0x9a   : > { %s734_s23 = sshll.u32 %s727_s30, 4  ;;  %s3232_s5 = sshll.u32 %s3318_s8, 4  ;;  %s735_s23 = int_to_ptr.vmem [resolvable:$true] %s734_s23  ;;  %s3233_s5 = int_to_ptr.vmem [resolvable:$false] %s3232_s5 }
  0x9b   : > { %s3227_s29 = scalar_lea.vmem %s735_s23, 16  ;;  %s3234_s25 = scalar_lea.vmem %s3233_s5, 32 }
  0x9c   : > { %p3228_p13 = scmp.ne.s32.totalorder %s735_s23, %s3227_s29  ;;  %p3235_p6 = scmp.lt.s32.totalorder %s735_s23, %s3233_s5 }
  0x9d   : > { %p3236_p1 = scmp.lt.s32.totalorder %s3234_s25, %s3227_s29 }
  0x9e   : > { %p3230_p4 = pnand %p3228_p13, %p3523_p10 }
  0x9f   : > { %p3237_p3 = por %p3236_p1, %p3235_p6 }
  0xa0   : > { %p3231_p0 = pneg %p3230_p4 }
  0xa2   : > { %p3238_p2 = pnand %p3237_p3, %p3231_p0 }
  0xa4   : > { %3241 = shalt.err (!%p3238_p2)
}
  0xa5   : > { %2798 = dma.hbm_to_vmem [thread:$0]  (!%p3482_p12), %s732_s1, 16, %s735_s23, %s3519_s22  }
  0xa6   : > { %743 = sbr.rel (%p3468_p8) target bundleno = 3594 (0xe0a), region = 92  ;;  %p3998_p11 = scmp.ne.s32.totalorder (!%p3468_p8), %s3978_s21, 0 }
  0xab   : > { %3267 = dma.done.wait (%p3998_p11), [#allocation4], 16  }
  0xac   : > { %3269 = vsyncadd (%p3998_p11), [#allocation4], 4294967280 }
  0xad   : > { %3271 = dma.done.wait (%p3998_p11), [#allocation6], 16  }
  0xae   : > { %3273 = vsyncadd (%p3998_p11), [#allocation6], 4294967280  ;;  %s3999_s28 = sadd.s32 4294967295, %s3304_s19   ;;  %s4000_s27 = sld [smem:[#allocation18_spill]] }
  0xaf   : > { %s4001_s16 = sld [smem:[#allocation21_spill]]  ;;  %s753_s22 = sand.u32 1, %s3999_s28  }
  0xb0   : > { %s754_s14 = scalar_lea.sflag [#allocation4], %s753_s22 }
  0xb4   : > { %s3625_s10 = sand.u32 1, %s4000_s27  }
  0xb5   : > { %s2744_s2 = smul.u32 192, %s3625_s10  ;;  %p4002_p8 = scmp.ne.s32.totalorder %s4001_s16, 0 }
  0xb7   : > { %s3628_s4 = scalar_lea.vmem [#allocation7], %s2744_s2 }
  0xb8   : > { %3275 = dma.done.wait (%p4002_p8), %s754_s14, 6192  }
  0xb9   : > { %3277 = vsyncadd (%p4002_p8), %s754_s14, 4294961104  ;;  %s2501_s1 = sshll.u32 %s3625_s10, 6  ;;  %s2502_s7 = sshll.u32 %s3625_s10, 7 }
  0xba   : > { %s3636_s18 = scalar_lea.vmem [#allocation8], %s2501_s1  ;;  %s3639_s20 = scalar_lea.vmem [#allocation10], %s2502_s7 }
  0xbb   : > { %3279 = dma.done.wait (%p3998_p11), [#allocation6], 16  }
  0xbc   : > { %3281 = vsyncadd (%p3998_p11), [#allocation6], 4294967280  ;;  %s4003_s29 = sld [smem:[#allocation20_spill]] }
  0xbd   : > { %s4005_s21 = sld [smem:[#allocation32_spill]] }
  0xbe   : > { %s4006_s7 = sld [smem:[#allocation29_spill]] }
  0xbf   : > { %s4007_s3 = sld [smem:[#allocation34_spill]] }
  0xc0   : > { %s4008_s25 = sld [smem:[#allocation38_spill]] }
  0xc1   : > { %s4009_s27 = sld [smem:[#allocation35_spill]] }
  0xc2   : > { %p921_p12 = scmp.lt.s32.totalorder %s4003_s29, 1  ;;  %p2507_p10 = scmp.ne.s32.totalorder %s4003_s29, 0 }
  0xc3   : > { %s4010_s14 = sld [smem:[#allocation24_spill]] (!%p2507_p10) }
  0xc4   : > { %s3649_s8 = scalar_select %p921_p12, %s4003_s29, 1 }
  0xc5   : > { %953 = sbr.rel (%p2507_p10) target bundleno = 514 (0x202), region = 132 }
  0xc6   : > { %s2745_s5 = smul.u32 3, %s3649_s8  ;;  %s930_s22 = scalar_lea.vmem %s4005_s21, %s3649_s8 }
  0xc7   : > { %s2600_s2 = sshll.u32 %s3649_s8, 7  ;;  %s2506_s9 = sshll.u32 %s3649_s8, 1 }
  0xc8   : > { %s3664_s23 = scalar_lea.vmem %s4006_s7, %s2745_s5  ;;  %s3669_s6 = scalar_lea.vmem %s4007_s3, %s2600_s2 }
  0xc9   : > { %s942_s11 = scalar_lea.vmem %s4008_s25, %s3649_s8  ;;  %s3679_s16 = scalar_lea.vmem %s4009_s27, %s2506_s9 }
  0xca   : > { %v954_v0 = vld [vmem:[%s4010_s14] sm:$0xff]  ;;  %v955_v1 = vld [vmem:[%s4010_s14 + $0x8] sm:$0xff]  ;;  %v2508_v17 = vld [vmem:[#allocation3] ss:$0 sm:$0xff] }
  0xcb   : > { %958 = vadd.xlane.f32.xlu0 %v954_v0  ;;  %v2509_v19 = vld [vmem:[#allocation5] ss:$0 sm:$0xff] }
  0xcf   : > { %960 = vadd.xlane.f32.xlu0 %v955_v1 }
 0x154   : > { %v959_v2 = vpop.xlane.xlu0 %958 }
 0x155   : > { %v963_v3 = vmul.f32 0.0078125, %v959_v2 }
 0x157   : > { %v965_v4 = vsub.f32 %v954_v0, %v963_v3 }
 0x158   : > { %v961_v5 = vpop.xlane.xlu0 %960 }
 0x159   : > { %v964_v6 = vmul.f32 0.0078125, %v961_v5  ;;  %v967_v7 = vmul.f32 %v965_v4, %v965_v4 }
 0x15b   : > { %v966_v8 = vsub.f32 %v955_v1, %v964_v6  ;;  %969 = vadd.xlane.f32.xlu1 %v967_v7 }
 0x15d   : > { %v968_v9 = vmul.f32 %v966_v8, %v966_v8 }
 0x15f   : > { %971 = vadd.xlane.f32.xlu1 %v968_v9 }
 0x1e4   : > { %v970_v10 = vpop.xlane.xlu1 %969 }
 0x1e5   : > { %v973_v11 = vmul.f32 0.0078125, %v970_v10 }
 0x1e7   : > { %v975_v12 = vadd.f32 1e-12, %v973_v11 }
 0x1e8   : > { %v972_v13 = vpop.xlane.xlu1 %971 }
 0x1e9   : > { %2867 = vrsqrt.f32 %v975_v12  ;;  %v974_v14 = vmul.f32 0.0078125, %v972_v13 }
 0x1eb   : > { %v976_v15 = vadd.f32 1e-12, %v974_v14 }
 0x1ed   : > { %2869 = vrsqrt.f32 %v976_v15 }
 0x1f6   : > { %v2868_v16 = vpop.eup %2867 }
 0x1f7   : > { %v979_v18 = vmul.f32 %v2868_v16, %v965_v4 }
 0x1f9   : > { %v987_v20 = vmul.f32 %v2508_v17, %v979_v18 }
 0x1fa   : > { %v2870_v21 = vpop.eup %2869 }
 0x1fb   : > { %v995_v22 = vadd.f32 %v2509_v19, %v987_v20  ;;  %v980_v23 = vmul.f32 %v2870_v21, %v966_v8 }
 0x1fd   : > { %997 = vst [vmem:[#allocation2] sm:$0xff] %v995_v22  ;;  %v988_v24 = vmul.f32 %v2508_v17, %v980_v23 }
 0x1ff   : > { %v996_v25 = vadd.f32 %v2509_v19, %v988_v24 }
 0x201   : > { %998 = vst [vmem:[#allocation2 + $0x8] sm:$0xff] %v996_v25 }
 0x202 PF: > { %v2876_v26 = vld [vmem:[%s3628_s4 + $0xac] ss:$12 sps:$4 sm:$0xff]   ;;  %v2878_v27 = vld [vmem:[%s3628_s4 + $0xa8] ss:$12 sps:$4 sm:$0xff]   ;;  %v3319_v28 = vmov 0   ;;  %v3320_v29 = vmov 0.0   ;;  %v1036_v55 = vlaneseq }
 0x203   : > { %1211 = vmatprep.mubr.bf16.mxu0 %v3319_v28  ;;  %2658 = vmatprep.subr.bf16.mxu1 %v3320_v29  ;;  %v2879_v30 = vld [vmem:[%s3628_s4 + $0x94] ss:$12 sps:$4 sm:$0xff]   ;;  %v2881_v31 = vld [vmem:[%s3628_s4 + $0x90] ss:$12 sps:$4 sm:$0xff]   ;;  %v2884_v33 = vld [vmem:[%s3628_s4 + $0x78] ss:$12 sps:$4 sm:$0xff]  }
 0x204   : > { %1179 = vmatprep.subr.bf16.mxu0 %v2876_v26  ;;  %v2882_v32 = vld [vmem:[%s3628_s4 + $0x7c] ss:$12 sps:$4 sm:$0xff]   ;;  %v2885_v34 = vld [vmem:[%s3628_s4 + $0x64] ss:$12 sps:$4 sm:$0xff]   ;;  %v2887_v35 = vld [vmem:[%s3628_s4 + $0x60] ss:$12 sps:$4 sm:$0xff]  }
 0x205   : > { %1180 = vmatpush1.bf16.msra.mxu0 %v2878_v27  ;;  %v2888_v36 = vld [vmem:[%s3628_s4 + $0x4c] ss:$12 sps:$4 sm:$0xff]   ;;  %v2900_v37 = vld [vmem:[%s3628_s4 + $0xb0] ss:$12 sps:$4 sm:$0xff]   ;;  %v2890_v39 = vld [vmem:[%s3628_s4 + $0x48] ss:$12 sps:$4 sm:$0xff]  }
 0x206   : > { %1181 = vmatprep.subr.bf16.mxu0 %v2879_v30  ;;  %2659 = vmatpush3.bf16.msra.mxu1 %v2900_v37  ;;  %v2901_v38 = vld [vmem:[%s3628_s4 + $0x98] ss:$12 sps:$4 sm:$0xff]   ;;  %v2891_v40 = vld [vmem:[%s3628_s4 + $0x34] ss:$12 sps:$4 sm:$0xff]   ;;  %v2893_v41 = vld [vmem:[%s3628_s4 + $0x30] ss:$12 sps:$4 sm:$0xff]  }
 0x207   : > { %2660 = vmatprep.subr.bf16.mxu1 %v3320_v29  ;;  %v2894_v42 = vld [vmem:[%s3628_s4 + $0x1c] ss:$12 sps:$4 sm:$0xff]   ;;  %v2902_v43 = vld [vmem:[%s3628_s4 + $0x80] ss:$12 sps:$4 sm:$0xff]   ;;  %v2896_v45 = vld [vmem:[%s3628_s4 + $0x18] ss:$12 sps:$4 sm:$0xff]  }
 0x208   : > { %v2903_v44 = vld [vmem:[%s3628_s4 + $0x68] ss:$12 sps:$4 sm:$0xff]   ;;  %v2897_v46 = vld [vmem:[%s3628_s4 + $0x4] ss:$12 sps:$4 sm:$0xff]   ;;  %v2899_v48 = vld [vmem:[%s3628_s4] ss:$12 sps:$4 sm:$0xff]  }
 0x209   : > { %1182 = vmatpush1.bf16.msra.mxu0 %v2881_v31  ;;  %v2904_v47 = vld [vmem:[%s3628_s4 + $0x50] ss:$12 sps:$4 sm:$0xff]   ;;  %v3716_v50 = vld [vmem:[#allocation2 + $0x8] sm:$0xff]  ;;  %v2906_v53 = vld [vmem:[%s3628_s4 + $0x20] ss:$12 sps:$4 sm:$0xff]   ;;  %vm3321_vm0 = vmmov 0  }
 0x20a   : > { %1183 = vmatprep.subr.bf16.mxu0 %v2882_v32  ;;  %2661 = vmatpush3.bf16.msra.mxu1 %v2901_v38  ;;  %v3714_v49 = vld [vmem:[#allocation2] sm:$0xff]  ;;  %v2905_v51 = vld [vmem:[%s3628_s4 + $0x38] ss:$12 sps:$4 sm:$0xff]   ;;  %v2907_v54 = vld [vmem:[%s3628_s4 + $0x8] ss:$12 sps:$4 sm:$0xff]   ;;  %v3735_v56 = vshrl.u32 %v1036_v55, 7 }
 0x20b   : > { %2662 = vmatprep.subr.bf16.mxu1 %v3320_v29  ;;  %v1001_v52 = vpack.c.bf16 %v3716_v50, %v3714_v49  ;;  %2674 = vmatprep.mubr.msk.bf16.mxu1 %vm3321_vm0, %v3320_v29  ;;  %v1034_v59 = vld [vmem:[%s3664_s23] sm:$0x7]  ;;  %vm1268_vm1 = vcmask 523264   ;;  %s4011_s13 = sld [smem:[#allocation25_spill]]  ;;  %vm1320_vm2 = vcmask 130048   ;;  %s3322_s23 = smov 64  }
 0x20c   : > { %v1042_v57 = vsub.s32 1, %v3735_v56  ;;  %v1038_v0 = vsub.s32 0, %v3735_v56  ;;  %v1046_v9 = vsub.s32 2, %v3735_v56  ;;  %s4012_s28 = sld [smem:[#allocation31_spill]] }
 0x20d   : > { %1184 = vmatpush1.bf16.msra.mxu0 %v2884_v33  ;;  %s4019_s5 = sld [smem:[#allocation20_spill]] }
 0x20e   : > { %1185 = vmatprep.subr.bf16.mxu0 %v2885_v34  ;;  %2663 = vmatpush3.bf16.msra.mxu1 %v2902_v43  ;;  %v1043_v61 = vrot.slane %v1034_v59, %v1042_v57  ;;  %v1039_v4 = vrot.slane %v1034_v59, %v1038_v0  ;;  %v1047_v10 = vrot.slane %v1034_v59, %v1046_v9 }
 0x20f   : > { %2664 = vmatprep.subr.bf16.mxu1 %v3320_v29 }
 0x211   : > { %1186 = vmatpush1.bf16.msra.mxu0 %v2887_v35  ;;  %v1263_v19 = vld [vmem:[%s4011_s13] sm:$0xff]  ;;  %v1264_v24 = vld [vmem:[%s4011_s13 + $0x8] sm:$0xff] }
 0x212   : > { %1187 = vmatprep.subr.bf16.mxu0 %v2888_v36  ;;  %2665 = vmatpush3.bf16.msra.mxu1 %v2903_v44  ;;  %s4013_s2 = scalar_lea.vmem %s4012_s28, %s3649_s8 }
 0x213   : > { %2666 = vmatprep.subr.bf16.mxu1 %v3320_v29  ;;  %p2584_p5 = scmp.ne.s32.totalorder %s4019_s5, 1 }
 0x214   : > { %s4020_s24 = sld [smem:[#allocation39_spill]] (!%p2584_p5) }
 0x215   : > { %1188 = vmatpush1.bf16.msra.mxu0 %v2890_v39 }
 0x216   : > { %1189 = vmatprep.subr.bf16.mxu0 %v2891_v40  ;;  %2667 = vmatpush3.bf16.msra.mxu1 %v2904_v47 }
 0x217   : > { %2668 = vmatprep.subr.bf16.mxu1 %v3320_v29 }
 0x219   : > { %1190 = vmatpush1.bf16.msra.mxu0 %v2893_v41 }
 0x21a   : > { %1191 = vmatprep.subr.bf16.mxu0 %v2894_v42  ;;  %2669 = vmatpush3.bf16.msra.mxu1 %v2905_v51 }
 0x21b   : > { %2670 = vmatprep.subr.bf16.mxu1 %v3320_v29 }
 0x21d   : > { %1192 = vmatpush1.bf16.msra.mxu0 %v2896_v45 }
 0x21e   : > { %1193 = vmatprep.subr.bf16.mxu0 %v2897_v46  ;;  %2671 = vmatpush3.bf16.msra.mxu1 %v2906_v53 }
 0x21f   : > { %2672 = vmatprep.subr.bf16.mxu1 %v3320_v29 }
 0x221   : > { %1194 = vmatpush1.bf16.msra.mxu0 %v2899_v48 }
 0x222   : > { %2702 = vmatprep.subr.bf16.mxu0 %v3320_v29  ;;  %2673 = vmatpush3.bf16.msra.mxu1 %v2907_v54 }
 0x223   : > { %2678 = vmatprep.subr.bf16.mxu1 %v3320_v29 }
 0x224   : > { %1212 = vmatmul.mubr.bf16.vlgmr.msra.gmra.mxu0 %v1001_v52 }
 0x225   : > { %2718 = vmatprep.mubr.msk.bf16.mxu0 %vm3321_vm0, %v3320_v29  ;;  %2675 = vmatmul.mubr.bf16.vlgmr.msra.gmra.mxu1 %v1001_v52 }
 0x226   : > { %2680 = vmatprep.mubr.msk.bf16.mxu1 %vm3321_vm0, %v3320_v29 }
 0x2e4   : > { %v1213_v58 = vpop.f32.mrf.mxu0 }
 0x2e5   : > { %v1214_v7 = vadd.f32 %v1213_v58, %v1039_v4  ;;  %v1256_v11 = vpop.f32.mrf.mxu1 }
 0x2e6   : > { %v1215_v60 = vpop.f32.mrf.mxu0  ;;  %v1257_v13 = vadd.f32 %v1256_v11, %v1047_v10 }
 0x2e7   : > { %v1216_v1 = vadd.f32 %v1215_v60, %v1043_v61  ;;  %v2676_v12 = vpop.f32.mrf.mxu1 }
 0x2e8   : > { %v1217_v62 = vpop.f32.mrf.mxu0 }
 0x2e9   : > { %v1218_v6 = vadd.f32 %v1217_v62, %v1039_v4  ;;  %v1259_v14 = vpop.f32.mrf.mxu1 }
 0x2ea   : > { %v1219_v63 = vpop.f32.mrf.mxu0  ;;  %v1260_v15 = vadd.f32 %v1259_v14, %v1047_v10 }
 0x2eb   : > { %v1220_v2 = vadd.f32 %v1219_v63, %v1043_v61  ;;  %v1265_v8 = vpack.c.bf16 %v1218_v6, %v1214_v7  ;;  %v2677_v16 = vpop.f32.mrf.mxu1 }
 0x2ec   : > { %v3750_v17 = vpack.c.bf16 %v1260_v15, %v1257_v13 }
 0x2ed   : > { %v1266_v3 = vpack.c.bf16 %v1220_v2, %v1216_v1 }
 0x2ef   : > { %v1273_v5 = vsel %vm1268_vm1, %v1266_v3, 0 }
 0x2f0   : > { %2679 = vmatpush3.bf16.xpose.msra.mxu1 %v1273_v5 }
 0x2f1   : > { %2684 = vmatprep.subr.bf16.mxu1 %v3320_v29 }
 0x2f7   : > { %2681 = vmatmul.mubr.msk.bf16.vlgmr.msra.gmra.mxu1 %vm1268_vm1, %v1265_v8 }
 0x2f8   : > { %2686 = vmatprep.mubr.msk.bf16.mxu1 %vm3321_vm0, %v3320_v29  ;;  %2685 = vmatpush3.bf16.msra.mxu1 %v3750_v17 }
 0x2f9   : > { %2690 = vmatprep.subr.bf16.mxu1 %v3320_v29 }
 0x3b7   : > { %v1309_v18 = vpop.f32.mrf.mxu1 }
 0x3b8   : > { %v1316_v20 = vmul.f32 0.125, %v1309_v18 }
 0x3b9   : > { %v2682_v21 = vpop.f32.mrf.mxu1 }
 0x3ba   : > { %v1318_v22 = vadd.f32 %v1316_v20, %v1263_v19 }
 0x3bb   : > { %v1312_v23 = vpop.f32.mrf.mxu1 }
 0x3bc   : > { %v1317_v25 = vmul.f32 0.125, %v1312_v23  ;;  %v1321_v26 = vsel %vm1320_vm2, %v1318_v22, -inf }
 0x3bd   : > { %1322 = vmax.xlane.f32.xlu0 %v1321_v26  ;;  %v2683_v27 = vpop.f32.mrf.mxu1  ;;  %v2909_v26 = vld [vmem:[%s3636_s18 + $0x30] sm:$0xff]  }
 0x3be   : > { %v1319_v30 = vadd.f32 %v1317_v25, %v1264_v24  ;;  %v2910_v27 = vld [vmem:[%s3636_s18 + $0x28] sm:$0xff]  }
 0x3c0   : > { %v1324_v31 = vsel %vm1320_vm2, %v1319_v30, -inf }
 0x3c1   : > { %1325 = vmax.xlane.f32.xlu0 %v1324_v31  ;;  %v2912_v31 = vld [vmem:[%s3636_s18 + $0x18] sm:$0xff]  }
 0x3d7   : > { %1392 = vrot.lane.b32.xlu0 %v1266_v3, %s3322_s23 }
 0x446   : > { %v1323_v32 = vpop.xlane.xlu0 %1322 }
 0x447   : > { %v1327_v33 = vsub.f32 %v1318_v22, %v1323_v32  ;;  %v2914_v32 = vld [vmem:[%s3636_s18 + $0x8] sm:$0xff]  }
 0x449   : > { %v1329_v34 = vmul.f32 1.442695, %v1327_v33  ;;  %v2915_v33 = vld [vmem:[%s3636_s18] sm:$0xff]  }
 0x44a   : > { %v1326_v35 = vpop.xlane.xlu0 %1325 }
 0x44b   : > { %2956 = vpow2.f32 %v1329_v34  ;;  %v1328_v36 = vsub.f32 %v1319_v30, %v1326_v35  ;;  %v2911_v30 = vld [vmem:[%s3636_s18 + $0x20] sm:$0xff]  }
 0x44d   : > { %v1331_v37 = vmul.f32 1.442695, %v1328_v36 }
 0x44e   : > { %v1393_v48 = vpop.permute.xlu0 %1392 }
 0x44f   : > { %2958 = vpow2.f32 %v1331_v37  ;;  %v1398_v52 = vsel %vm1268_vm1, %v1393_v48, 0 }
 0x458   : > { %v2957_v38 = vpop.eup %2956 }
 0x459   : > { %v1333_v39 = vsel %vm1320_vm2, %v2957_v38, 0.0 }
 0x45a   : > { %1334 = vadd.xlane.f32.xlu1 %v1333_v39 }
 0x45c   : > { %v2959_v40 = vpop.eup %2958 }
 0x45d   : > { %v1336_v41 = vsel %vm1320_vm2, %v2959_v40, 0.0 }
 0x45e   : > { %1337 = vadd.xlane.f32.xlu1 %v1336_v41 }
 0x46f   : > { %1389 = vrot.lane.b32.xlu1 %v1265_v8, %s3322_s23 }
 0x4e3   : > { %v1335_v42 = vpop.xlane.xlu1 %1334 }
 0x4e4   : > { %2960 = vrcp.f32 %v1335_v42 }
 0x4e7   : > { %v1338_v43 = vpop.xlane.xlu1 %1337 }
 0x4e8   : > { %2962 = vrcp.f32 %v1338_v43 }
 0x4eb   : > { %v1390_v53 = vpop.permute.xlu1 %1389 }
 0x4f1   : > { %v2961_v44 = vpop.eup %2960 }
 0x4f2   : > { %v1341_v46 = vmul.f32 %v2961_v44, %v2957_v38  ;;  %v2538_v44 = vld [vmem:[%s4013_s2] ss:$0 sm:$0xff] }
 0x4f5   : > { %v2963_v45 = vpop.eup %2962 }
 0x4f6   : > { %v1342_v47 = vmul.f32 %v2963_v45, %v2959_v40 }
 0x4f8   : > { %v1343_v51 = vpack.c.bf16 %v1342_v47, %v1341_v46 }
 0x4fa   : > { %2687 = vmatmul.mubr.msk.bf16.vlgmr.msra.gmra.mxu1 %vm1320_vm2, %v1343_v51 }
 0x4fb   : > { %2691 = vmatpush3.bf16.xpose.msra.mxu1 %v1398_v52  ;;  %2692 = vmatprep.mubr.msk.bf16.mxu1 %vm3321_vm0, %v3320_v29 }
 0x4fc   : > { %2696 = vmatprep.subr.bf16.mxu1 %v3320_v29 }
 0x502   : > { %2693 = vmatmul.mubr.msk.bf16.vlgmr.msra.gmra.mxu1 %vm1268_vm1, %v1390_v53 }
 0x503   : > { %2698 = vmatprep.mubr.msk.bf16.mxu1 %vm3321_vm0, %v3320_v29 }
 0x5ba   : > { %v3774_v54 = vpop.f32.mrf.mxu1 }
 0x5bc   : > { %v2688_v55 = vpop.f32.mrf.mxu1 }
 0x5be   : > { %v3776_v58 = vpop.f32.mrf.mxu1 }
 0x5c0   : > { %v2689_v59 = vpop.f32.mrf.mxu1 }
 0x5c2   : > { %v1434_v60 = vpop.f32.mrf.mxu1 }
 0x5c3   : > { %v1441_v61 = vmul.f32 0.125, %v1434_v60 }
 0x5c4   : > { %v2694_v62 = vpop.f32.mrf.mxu1 }
 0x5c5   : > { %v1443_v63 = vadd.f32 %v1441_v61, %v1263_v19 }
 0x5c6   : > { %v1437_v1 = vpop.f32.mrf.mxu1 }
 0x5c7   : > { %v1442_v2 = vmul.f32 0.125, %v1437_v1  ;;  %v1445_v3 = vsel %vm1320_vm2, %v1443_v63, -inf }
 0x5c8   : > { %1446 = vmax.xlane.f32.xlu1 %v1445_v3  ;;  %v2695_v4 = vpop.f32.mrf.mxu1  ;;  %v2919_v3 = vld [vmem:[%s3669_s6 + $0x60] ss:$8 sps:$4 sm:$0xff]  }
 0x5c9   : > { %v1444_v5 = vadd.f32 %v1442_v2, %v1264_v24  ;;  %v2921_v2 = vld [vmem:[%s3669_s6 + $0x64] ss:$8 sps:$4 sm:$0xff]   ;;  %v2924_v4 = vld [vmem:[%s3669_s6 + $0x54] ss:$8 sps:$4 sm:$0xff]  }
 0x5cb   : > { %v1448_v6 = vsel %vm1320_vm2, %v1444_v5, -inf }
 0x5cc   : > { %1449 = vmax.xlane.f32.xlu0 %v1448_v6  ;;  %v2925_v6 = vld [vmem:[%s3669_s6 + $0x40] ss:$8 sps:$4 sm:$0xff]  }
 0x651   : > { %v1447_v7 = vpop.xlane.xlu1 %1446 }
 0x652   : > { %v1451_v8 = vsub.f32 %v1443_v63, %v1447_v7  ;;  %v2927_v7 = vld [vmem:[%s3669_s6 + $0x44] ss:$8 sps:$4 sm:$0xff]  }
 0x654   : > { %v1453_v9 = vmul.f32 1.442695, %v1451_v8  ;;  %v2930_v8 = vld [vmem:[%s3669_s6 + $0x34] ss:$8 sps:$4 sm:$0xff]  }
 0x655   : > { %v1450_v10 = vpop.xlane.xlu0 %1449 }
 0x656   : > { %2964 = vpow2.f32 %v1453_v9  ;;  %v1452_v11 = vsub.f32 %v1444_v5, %v1450_v10  ;;  %v2922_v5 = vld [vmem:[%s3669_s6 + $0x50] ss:$8 sps:$4 sm:$0xff]   ;;  %v2933_v10 = vld [vmem:[%s3669_s6 + $0x24] ss:$8 sps:$4 sm:$0xff]  }
 0x657   : > { %v2928_v9 = vld [vmem:[%s3669_s6 + $0x30] ss:$8 sps:$4 sm:$0xff]  }
 0x658   : > { %v1455_v12 = vmul.f32 1.442695, %v1452_v11  ;;  %v2931_v11 = vld [vmem:[%s3669_s6 + $0x20] ss:$8 sps:$4 sm:$0xff]  }
 0x65a   : > { %2966 = vpow2.f32 %v1455_v12  ;;  %v2936_v12 = vld [vmem:[%s3669_s6 + $0x14] ss:$8 sps:$4 sm:$0xff]  }
 0x663   : > { %v2965_v13 = vpop.eup %2964 }
 0x664   : > { %v1457_v14 = vsel %vm1320_vm2, %v2965_v13, 0.0 }
 0x665   : > { %1458 = vadd.xlane.f32.xlu0 %v1457_v14  ;;  %v2939_v14 = vld [vmem:[%s3669_s6 + $0x4] ss:$8 sps:$4 sm:$0xff]  }
 0x667   : > { %v2967_v15 = vpop.eup %2966 }
 0x668   : > { %v1460_v16 = vsel %vm1320_vm2, %v2967_v15, 0.0 }
 0x669   : > { %1461 = vadd.xlane.f32.xlu1 %v1460_v16 }
 0x67b   : > { %1469 = vrot.lane.b32.xlu0 %v3750_v17, %s3322_s23  ;;  %v2908_v17 = vld [vmem:[%s3636_s18 + $0x38] sm:$0xff]  }
 0x67c   : > { %2703 = vmatpush3.bf16.msra.mxu0 %v2908_v17 }
 0x67d   : > { %2704 = vmatprep.subr.bf16.mxu0 %v3320_v29 }
 0x680   : > { %2705 = vmatpush3.bf16.msra.mxu0 %v2909_v26 }
 0x681   : > { %2706 = vmatprep.subr.bf16.mxu0 %v3320_v29 }
 0x684   : > { %2707 = vmatpush3.bf16.msra.mxu0 %v2910_v27 }
 0x685   : > { %2708 = vmatprep.subr.bf16.mxu0 %v3320_v29 }
 0x688   : > { %2709 = vmatpush3.bf16.msra.mxu0 %v2911_v30 }
 0x689   : > { %2710 = vmatprep.subr.bf16.mxu0 %v3320_v29 }
 0x68c   : > { %2711 = vmatpush3.bf16.msra.mxu0 %v2912_v31 }
 0x68d   : > { %2712 = vmatprep.subr.bf16.mxu0 %v3320_v29 }
 0x6ee   : > { %v1459_v18 = vpop.xlane.xlu0 %1458 }
 0x6ef   : > { %2968 = vrcp.f32 %v1459_v18 }
 0x6f2   : > { %v1462_v19 = vpop.xlane.xlu1 %1461  ;;  %v1470_v20 = vpop.permute.xlu0 %1469 }
 0x6f3   : > { %2970 = vrcp.f32 %v1462_v19  ;;  %2697 = vmatpush3.bf16.msra.mxu1 %v1470_v20 }
 0x6fc   : > { %v2969_v21 = vpop.eup %2968 }
 0x6fd   : > { %v1465_v23 = vmul.f32 %v2969_v21, %v2965_v13  ;;  %v2934_v13 = vld [vmem:[%s3669_s6 + $0x10] ss:$8 sps:$4 sm:$0xff]  }
 0x700   : > { %v2971_v22 = vpop.eup %2970 }
 0x701   : > { %v1466_v24 = vmul.f32 %v2971_v22, %v2967_v15  ;;  %v2937_v15 = vld [vmem:[%s3669_s6] ss:$8 sps:$4 sm:$0xff]  }
 0x703   : > { %v1467_v25 = vpack.c.bf16 %v1466_v24, %v1465_v23 }
 0x705   : > { %2699 = vmatmul.mubr.msk.bf16.vlgmr.msra.gmra.mxu1 %vm1320_vm2, %v1467_v25  ;;  %v2547_v25 = vld [vmem:[%s930_s22] ss:$0 sm:$0xff] }
 0x706   : > { %1823 = vmatprep.mubr.bf16.mxu1 %v3319_v28  ;;  %v2913_v28 = vld [vmem:[%s3636_s18 + $0x10] sm:$0xff]  }
 0x707   : > { %2713 = vmatpush3.bf16.msra.mxu0 %v2913_v28 }
 0x708   : > { %2714 = vmatprep.subr.bf16.mxu0 %v3320_v29 }
 0x70b   : > { %2715 = vmatpush3.bf16.msra.mxu0 %v2914_v32 }
 0x70c   : > { %2716 = vmatprep.subr.bf16.mxu0 %v3320_v29 }
 0x70f   : > { %2717 = vmatpush3.bf16.msra.mxu0 %v2915_v33 }
 0x7c5   : > { %v1509_v34 = vpop.f32.mrf.mxu1 }
 0x7c7   : > { %v2700_v35 = vpop.f32.mrf.mxu1 }
 0x7c8   : > { %v2941_v35 = vld [vmem:[%s3639_s20 + $0x38] sm:$0xff]  }
 0x7c9   : > { %v1512_v36 = vpop.f32.mrf.mxu1 }
 0x7ca   : > { %v2871_v37 = vpack.i.bf16 %v1512_v36, %v1509_v34  ;;  %v2940_v34 = vld [vmem:[%s3639_s20 + $0x78] sm:$0xff]   ;;  %v2942_v36 = vld [vmem:[%s3639_s20 + $0x70] sm:$0xff]  }
 0x7cb   : > { %v2701_v38 = vpop.f32.mrf.mxu1  ;;  %2627 = vmatprep.subr.bf16.mxu0 %v2940_v34 }
 0x7cc   : > { %2872 = vrot.lane.b32.xlu1 %v2871_v37, %s3322_s23  ;;  %v2943_v37 = vld [vmem:[%s3639_s20 + $0x30] sm:$0xff]   ;;  %v2944_v38 = vld [vmem:[%s3639_s20 + $0x68] sm:$0xff]  }
 0x83e   : > { %v2873_v39 = vpop.permute.xlu1 %2872 }
 0x83f   : > { %v2875_v40 = vunpack.i.h.bf16 %v2873_v39  ;;  %v2874_v41 = vunpack.i.l.bf16 %v2873_v39  ;;  %v2945_v39 = vld [vmem:[%s3639_s20 + $0x28] sm:$0xff]  }
 0x841   : > { %v1525_v42 = vsel %vm1268_vm1, %v3776_v58, %v2875_v40  ;;  %v1524_v29 = vsel %vm1268_vm1, %v3774_v54, %v2874_v41  ;;  %v2916_v54 = vld [vmem:[%s3669_s6 + $0x70] ss:$8 sps:$4 sm:$0xff]   ;;  %v2918_v58 = vld [vmem:[%s3669_s6 + $0x74] ss:$8 sps:$4 sm:$0xff]   ;;  %s4015_s6 = scalar_lea.vmem [#allocation9], %s3625_s10 }
 0x842   : > { %v1526_v43 = vpack.c.bf16 %v1525_v42, %v1524_v29  ;;  %1791 = vmatprep.subr.bf16.mxu1 %v2918_v58  ;;  %v2548_v30 = vld [vmem:[%s4015_s6] ss:$0 sm:$0xff]  ;;  %v2946_v40 = vld [vmem:[%s3639_s20 + $0x60] sm:$0xff]   ;;  %v2948_v42 = vld [vmem:[%s3639_s20 + $0x58] sm:$0xff]  }
 0x843   : > { %1792 = vmatpush1.bf16.msra.mxu1 %v2916_v54  ;;  %v2947_v41 = vld [vmem:[%s3639_s20 + $0x20] sm:$0xff]   ;;  %v2949_v29 = vld [vmem:[%s3639_s20 + $0x18] sm:$0xff]  }
 0x844   : > { %2719 = vmatmul.mubr.bf16.vlgmr.msra.gmra.mxu0 %v1526_v43  ;;  %1793 = vmatprep.subr.bf16.mxu1 %v2921_v2  ;;  %v2950_v43 = vld [vmem:[%s3639_s20 + $0x50] sm:$0xff]  }
 0x845   : > { %2628 = vmatpush3.bf16.msra.mxu0 %v2941_v35 }
 0x846   : > { %2629 = vmatprep.subr.bf16.mxu0 %v2942_v36 }
 0x847   : > { %1794 = vmatpush1.bf16.msra.mxu1 %v2919_v3 }
 0x848   : > { %1795 = vmatprep.subr.bf16.mxu1 %v2924_v4 }
 0x849   : > { %2630 = vmatpush3.bf16.msra.mxu0 %v2943_v37 }
 0x84a   : > { %2631 = vmatprep.subr.bf16.mxu0 %v2944_v38 }
 0x84b   : > { %1796 = vmatpush1.bf16.msra.mxu1 %v2922_v5 }
 0x84c   : > { %1797 = vmatprep.subr.bf16.mxu1 %v2927_v7 }
 0x84d   : > { %2632 = vmatpush3.bf16.msra.mxu0 %v2945_v39 }
 0x84e   : > { %2633 = vmatprep.subr.bf16.mxu0 %v2946_v40 }
 0x84f   : > { %1798 = vmatpush1.bf16.msra.mxu1 %v2925_v6 }
 0x850   : > { %1799 = vmatprep.subr.bf16.mxu1 %v2930_v8 }
 0x851   : > { %2634 = vmatpush3.bf16.msra.mxu0 %v2947_v41 }
 0x852   : > { %2635 = vmatprep.subr.bf16.mxu0 %v2948_v42 }
 0x853   : > { %1800 = vmatpush1.bf16.msra.mxu1 %v2928_v9 }
 0x854   : > { %1801 = vmatprep.subr.bf16.mxu1 %v2933_v10 }
 0x855   : > { %2636 = vmatpush3.bf16.msra.mxu0 %v2949_v29 }
 0x856   : > { %2637 = vmatprep.subr.bf16.mxu0 %v2950_v43 }
 0x857   : > { %1802 = vmatpush1.bf16.msra.mxu1 %v2931_v11 }
 0x858   : > { %1803 = vmatprep.subr.bf16.mxu1 %v2936_v12 }
 0x85b   : > { %1804 = vmatpush1.bf16.msra.mxu1 %v2934_v13 }
 0x85c   : > { %1805 = vmatprep.subr.bf16.mxu1 %v2939_v14 }
 0x85f   : > { %1806 = vmatpush1.bf16.msra.mxu1 %v2937_v15 }
 0x904   : > { %v1632_v45 = vpop.f32.mrf.mxu0 }
 0x905   : > { %v1633_v46 = vadd.f32 %v2538_v44, %v1632_v45  ;;  %v2952_v45 = vld [vmem:[%s3639_s20 + $0x48] sm:$0xff]  }
 0x906   : > { %v2720_v47 = vpop.f32.mrf.mxu0 }
 0x907   : > { %v1639_v48 = vadd.f32 %v1633_v46, %v3714_v49  ;;  %v2953_v46 = vld [vmem:[%s3639_s20 + $0x8] sm:$0xff]   ;;  %v2954_v47 = vld [vmem:[%s3639_s20 + $0x40] sm:$0xff]  }
 0x908   : > { %v1635_v51 = vpop.f32.mrf.mxu0 }
 0x909   : > { %v1636_v52 = vadd.f32 %v2538_v44, %v1635_v51  ;;  %1643 = vadd.xlane.f32.xlu1 %v1639_v48  ;;  %v2951_v44 = vld [vmem:[%s3639_s20 + $0x10] sm:$0xff]   ;;  %v1699_v51 = vld [vmem:[%s3679_s16] sm:$0x3]  ;;  %s4018_s16 = scalar_lea.vmem [#allocation12], %s3625_s10 }
 0x90a   : > { %v2721_v53 = vpop.f32.mrf.mxu0  ;;  %2638 = vmatpush3.bf16.msra.mxu0 %v2951_v44  ;;  %v2582_v44 = vld [vmem:[%s942_s11] ss:$0 sm:$0xff] }
 0x90b   : > { %v1640_v55 = vadd.f32 %v1636_v52, %v3716_v50  ;;  %2639 = vmatprep.subr.bf16.mxu0 %v2952_v45  ;;  %v1704_v52 = vrot.slane %v1699_v51, %v1038_v0  ;;  %v1708_v53 = vrot.slane %v1699_v51, %v1042_v57 }
 0x90d   : > { %1645 = vadd.xlane.f32.xlu0 %v1640_v55 }
 0x90e   : > { %2640 = vmatpush3.bf16.msra.mxu0 %v2953_v46  ;;  %v2583_v46 = vld [vmem:[%s4018_s16] ss:$0 sm:$0xff] }
 0x90f   : > { %2641 = vmatprep.subr.bf16.mxu0 %v2954_v47 }
 0x992   : > { %v1644_v59 = vpop.xlane.xlu1 %1643 }
 0x993   : > { %v1648_v60 = vmul.f32 0.0078125, %v1644_v59 }
 0x995   : > { %v1650_v61 = vsub.f32 %v1639_v48, %v1648_v60  ;;  %v2955_v48 = vld [vmem:[%s3639_s20] sm:$0xff]   ;;  %s4016_s20 = scalar_lea.vmem [#allocation11], %s3625_s10 }
 0x996   : > { %v1646_v49 = vpop.xlane.xlu0 %1645  ;;  %2642 = vmatpush3.bf16.msra.mxu0 %v2955_v48 }
 0x997   : > { %v1649_v62 = vmul.f32 0.0078125, %v1646_v49  ;;  %v1652_v63 = vmul.f32 %v1650_v61, %v1650_v61 }
 0x999   : > { %v1651_v1 = vsub.f32 %v1640_v55, %v1649_v62  ;;  %1654 = vadd.xlane.f32.xlu0 %v1652_v63 }
 0x99b   : > { %v1653_v50 = vmul.f32 %v1651_v1, %v1651_v1 }
 0x99d   : > { %1656 = vadd.xlane.f32.xlu1 %v1653_v50 }
 0xa22   : > { %v1655_v16 = vpop.xlane.xlu0 %1654 }
 0xa23   : > { %v1658_v18 = vmul.f32 0.0078125, %v1655_v16 }
 0xa25   : > { %v1660_v19 = vadd.f32 1e-12, %v1658_v18 }
 0xa26   : > { %v1657_v20 = vpop.xlane.xlu1 %1656 }
 0xa27   : > { %2972 = vrsqrt.f32 %v1660_v19  ;;  %v1659_v21 = vmul.f32 0.0078125, %v1657_v20  ;;  %v2565_v20 = vld [vmem:[%s4016_s20] ss:$0 sm:$0xff]  ;;  %s4021_s20 = sld [smem:[#allocation40_spill]] (!%p2584_p5) }
 0xa29   : > { %v1661_v22 = vadd.f32 1e-12, %v1659_v21 }
 0xa2b   : > { %2974 = vrsqrt.f32 %v1661_v22 }
 0xa34   : > { %v2973_v23 = vpop.eup %2972 }
 0xa35   : > { %v1664_v24 = vmul.f32 %v2973_v23, %v1650_v61 }
 0xa37   : > { %v1672_v27 = vmul.f32 %v2547_v25, %v1664_v24 }
 0xa38   : > { %v2975_v17 = vpop.eup %2974 }
 0xa39   : > { %v1665_v26 = vmul.f32 %v2975_v17, %v1651_v1  ;;  %v3836_v28 = vadd.f32 %v2548_v30, %v1672_v27 }
 0xa3b   : > { %v1673_v31 = vmul.f32 %v2547_v25, %v1665_v26 }
 0xa3d   : > { %v3838_v32 = vadd.f32 %v2548_v30, %v1673_v31 }
 0xa3f   : > { %v1682_v33 = vpack.c.bf16 %v3838_v32, %v3836_v28 }
 0xa41   : > { %1824 = vmatmul.mubr.bf16.vlgmr.msra.gmra.mxu1 %v1682_v33 }
 0xb01   : > { %v1825_v55 = vpop.f32.mrf.mxu1 }
 0xb02   : > { %v1826_v54 = vadd.f32 %v1825_v55, %v1704_v52 }
 0xb03   : > { %v1827_v58 = vpop.f32.mrf.mxu1 }
 0xb04   : > { %v1828_v59 = vadd.f32 %v1827_v58, %v1708_v53  ;;  %v1838_v60 = vmul.f32 0.70710677, %v1826_v54  ;;  %v1834_v11 = vmul.f32 0.5, %v1826_v54 }
 0xb05   : > { %v1829_v61 = vpop.f32.mrf.mxu1 }
 0xb06   : > { %v1839_v49 = vmul.f32 0.70710677, %v1828_v59  ;;  %v1830_v62 = vadd.f32 %v1829_v61, %v1704_v52  ;;  %v1835_v8 = vmul.f32 0.5, %v1828_v59 }
 0xb07   : > { %v1831_v63 = vpop.f32.mrf.mxu1 }
 0xb08   : > { %2976 = verf.f32 %v1839_v49  ;;  %v1840_v1 = vmul.f32 0.70710677, %v1830_v62  ;;  %v1832_v50 = vadd.f32 %v1831_v63, %v1708_v53  ;;  %v1836_v7 = vmul.f32 0.5, %v1830_v62 }
 0xb09   : > { %2978 = verf.f32 %v1838_v60 }
 0xb0a   : > { %2980 = verf.f32 %v1840_v1  ;;  %v1841_v2 = vmul.f32 0.70710677, %v1832_v50  ;;  %v1837_v9 = vmul.f32 0.5, %v1832_v50 }
 0xb0c   : > { %2982 = verf.f32 %v1841_v2 }
 0xb15   : > { %v2977_v0 = vpop.eup %2976 }
 0xb16   : > { %v2979_v3 = vpop.eup %2978  ;;  %v1847_v57 = vadd.f32 1.0, %v2977_v0 }
 0xb17   : > { %v2981_v56 = vpop.eup %2980  ;;  %v1846_v6 = vadd.f32 1.0, %v2979_v3 }
 0xb18   : > { %v1848_v4 = vadd.f32 1.0, %v2981_v56  ;;  %v1851_v13 = vmul.f32 %v1847_v57, %v1835_v8 }
 0xb19   : > { %v2983_v5 = vpop.eup %2982  ;;  %v1850_v15 = vmul.f32 %v1846_v6, %v1834_v11 }
 0xb1a   : > { %v1849_v10 = vadd.f32 1.0, %v2983_v5  ;;  %v1852_v12 = vmul.f32 %v1848_v4, %v1836_v7 }
 0xb1c   : > { %v1853_v14 = vmul.f32 %v1849_v10, %v1837_v9  ;;  %v1854_v18 = vpack.c.bf16 %v1852_v12, %v1850_v15 }
 0xb1e   : > { %v1855_v16 = vpack.c.bf16 %v1853_v14, %v1851_v13 }
 0xb20   : > { %2023 = vmatprep.mubr.bf16.mxu0 %v1855_v16 }
 0xb21   : > { %2024 = vmatmul.mubr.bf16.vlgmr.msra.gmra.mxu0 %v1854_v18 }
 0xbe1   : > { %v2643_v19 = vpop.f32.mrf.mxu0 }
 0xbe3   : > { %v2644_v21 = vpop.f32.mrf.mxu0 }
 0xbe4   : > { %v2645_v22 = vadd.f32 %v2644_v21, %v2643_v19 }
 0xbe5   : > { %v2646_v23 = vpop.f32.mrf.mxu0 }
 0xbe6   : > { %v2026_v24 = vadd.f32 %v2645_v22, %v2565_v20 }
 0xbe7   : > { %v2647_v25 = vpop.f32.mrf.mxu0 }
 0xbe8   : > { %v2648_v17 = vadd.f32 %v2647_v25, %v2646_v23  ;;  %v2032_v26 = vadd.f32 %v2026_v24, %v3836_v28 }
 0xbea   : > { %v2029_v27 = vadd.f32 %v2648_v17, %v2565_v20  ;;  %2036 = vadd.xlane.f32.xlu0 %v2032_v26 }
 0xbec   : > { %v2033_v30 = vadd.f32 %v2029_v27, %v3838_v32 }
 0xbee   : > { %2038 = vadd.xlane.f32.xlu1 %v2033_v30 }
 0xc73   : > { %v2037_v31 = vpop.xlane.xlu0 %2036 }
 0xc74   : > { %v2040_v33 = vmul.f32 0.0078125, %v2037_v31 }
 0xc76   : > { %v2042_v34 = vsub.f32 %v2032_v26, %v2040_v33 }
 0xc77   : > { %v2039_v35 = vpop.xlane.xlu1 %2038 }
 0xc78   : > { %v2041_v36 = vmul.f32 0.0078125, %v2039_v35  ;;  %v2044_v37 = vmul.f32 %v2042_v34, %v2042_v34 }
 0xc7a   : > { %v2043_v38 = vsub.f32 %v2033_v30, %v2041_v36  ;;  %2046 = vadd.xlane.f32.xlu0 %v2044_v37 }
 0xc7c   : > { %v2045_v39 = vmul.f32 %v2043_v38, %v2043_v38 }
 0xc7e   : > { %2048 = vadd.xlane.f32.xlu1 %v2045_v39 }
 0xd03   : > { %v2047_v40 = vpop.xlane.xlu0 %2046 }
 0xd04   : > { %v2050_v41 = vmul.f32 0.0078125, %v2047_v40 }
 0xd06   : > { %v2052_v28 = vadd.f32 1e-12, %v2050_v41 }
 0xd07   : > { %v2049_v42 = vpop.xlane.xlu1 %2048 }
 0xd08   : > { %2984 = vrsqrt.f32 %v2052_v28  ;;  %v2051_v29 = vmul.f32 0.0078125, %v2049_v42 }
 0xd0a   : > { %v2053_v32 = vadd.f32 1e-12, %v2051_v29 }
 0xd0c   : > { %2986 = vrsqrt.f32 %v2053_v32 }
 0xd15   : > { %v2985_v43 = vpop.eup %2984 }
 0xd16   : > { %v2056_v45 = vmul.f32 %v2985_v43, %v2042_v34 }
 0xd18   : > { %v2064_v47 = vmul.f32 %v2582_v44, %v2056_v45 }
 0xd19   : > { %v2987_v48 = vpop.eup %2986 }
 0xd1a   : > { %v2072_v51 = vadd.f32 %v2583_v46, %v2064_v47  ;;  %v2057_v52 = vmul.f32 %v2987_v48, %v2043_v38 }
 0xd1c   : > { %2074 = vst [vmem:[#allocation2] sm:$0xff] %v2072_v51  ;;  %v2065_v53 = vmul.f32 %v2582_v44, %v2057_v52  ;;  %2079 = sbr.rel (%p2584_p5) target bundleno = 3594 (0xe0a), region = 136 }
 0xd1e   : > { %v2073_v55 = vadd.f32 %v2583_v46, %v2065_v53 }
 0xd20   : > { %2075 = vst [vmem:[#allocation2 + $0x8] sm:$0xff] %v2073_v55 }
 0xd21   : > { %v2988_v54 = vld [vmem:[%s4020_s24 + $0x38] sm:$0xff]   ;;  %v3323_v58 = vmov 0.0   ;;  %v2989_v59 = vld [vmem:[%s4020_s24 + $0x30] sm:$0xff]   ;;  %vm3324_vm3 = vmmov 0   ;;  %v2990_v60 = vld [vmem:[%s4020_s24 + $0x28] sm:$0xff]   ;;  %v2080_v50 = vpack.c.bf16 %v2073_v55, %v2072_v51 }
 0xd22   : > { %2722 = vmatprep.subr.bf16.mxu0 %v3323_v58  ;;  %2738 = vmatprep.mubr.msk.bf16.mxu0 %vm3324_vm3, %v3323_v58  ;;  %v2991_v61 = vld [vmem:[%s4020_s24 + $0x20] sm:$0xff]   ;;  %v2992_v49 = vld [vmem:[%s4020_s24 + $0x18] sm:$0xff]   ;;  %v2993_v62 = vld [vmem:[%s4020_s24 + $0x10] sm:$0xff]  }
 0xd23   : > { %2723 = vmatpush3.bf16.msra.mxu0 %v2988_v54  ;;  %v2994_v63 = vld [vmem:[%s4020_s24 + $0x8] sm:$0xff]   ;;  %v2995_v1 = vld [vmem:[%s4020_s24] sm:$0xff]   ;;  %v2585_v2 = vld [vmem:[#allocation13] ss:$0 sm:$0xff] }
 0xd24   : > { %2724 = vmatprep.subr.bf16.mxu0 %v3323_v58 }
 0xd27   : > { %2725 = vmatpush3.bf16.msra.mxu0 %v2989_v59 }
 0xd28   : > { %2726 = vmatprep.subr.bf16.mxu0 %v3323_v58 }
 0xd2b   : > { %2727 = vmatpush3.bf16.msra.mxu0 %v2990_v60 }
 0xd2c   : > { %2728 = vmatprep.subr.bf16.mxu0 %v3323_v58 }
 0xd2f   : > { %2729 = vmatpush3.bf16.msra.mxu0 %v2991_v61 }
 0xd30   : > { %2730 = vmatprep.subr.bf16.mxu0 %v3323_v58 }
 0xd33   : > { %2731 = vmatpush3.bf16.msra.mxu0 %v2992_v49 }
 0xd34   : > { %2732 = vmatprep.subr.bf16.mxu0 %v3323_v58 }
 0xd37   : > { %2733 = vmatpush3.bf16.msra.mxu0 %v2993_v62 }
 0xd38   : > { %2734 = vmatprep.subr.bf16.mxu0 %v3323_v58 }
 0xd3b   : > { %2735 = vmatpush3.bf16.msra.mxu0 %v2994_v63 }
 0xd3c   : > { %2736 = vmatprep.subr.bf16.mxu0 %v3323_v58 }
 0xd3f   : > { %2737 = vmatpush3.bf16.msra.mxu0 %v2995_v1 }
 0xd42   : > { %2739 = vmatmul.mubr.bf16.vlgmr.msra.gmra.mxu0 %v2080_v50 }
 0xe02   : > { %v2186_v0 = vpop.f32.mrf.mxu0 }
 0xe03   : > { %v2187_v3 = vadd.f32 %v2585_v2, %v2186_v0 }
 0xe04   : > { %v2740_v56 = vpop.f32.mrf.mxu0 }
 0xe05   : > { %2193 = vst [vmem:[%s4021_s20] sm:$0xff] %v2187_v3 }
 0xe06   : > { %v2189_v57 = vpop.f32.mrf.mxu0 }
 0xe07   : > { %v2190_v4 = vadd.f32 %v2585_v2, %v2189_v57 }
 0xe08   : > { %v2741_v5 = vpop.f32.mrf.mxu0 }
 0xe09   : > { %2194 = vst [vmem:[%s4021_s20 + $0x8] sm:$0xff] %v2190_v4 }
 0xe0a PF: > { %s30_s19 = sadd.s32 1, %s3304_s19   ;;  %s4022_s27 = sld [smem:[#allocation18_spill]] }
 0xe0b   : > { %p27_p7 = scmp.ge.s32.totalorder %s30_s19, 4   ;;  %s4023_s28 = sld [smem:[#allocation19_spill]] }
 0xe0c   : > { %s4024_s29 = sld [smem:[#allocation23_spill]]  ;;  %s4026_s30 = smov %s3300_s0 }
 0xe0d   : > { %s4025_s16 = sld [smem:[#allocation22_spill]] }
 0xe0f   :  { %29 = sbr.rel (!%p27_p7) target bundleno = 22 (0x16), region = 230 }
 0xe13   : > { %s4027_s0 = smov %s4025_s16 }
 0xe14   :  { %2217 = vsyncpa [#allocation4], 1 }
 0xe15   :  { %2219 = vsyncpa [#allocation4 + $0x1], 1 }
 0xe16   :  { %2220 = vsyncpa [#allocation6], 1 }

</bundles_post_ra>
